<compile_context>
chip_gen: v7x
topology: tpu7x:2x2x1
jax: 0.10.0
libtpu: 0.0.40
codegen_flags: <defaults>
</compile_context>

<pallas_src>
import functools

import jax
import jax.numpy as jnp
from jax import lax
from jax.experimental import pallas as pl
from jax.experimental.pallas import tpu as pltpu


def _resblock_kernel(x_ref, m_ref, w1_ref, b1_ref, w2_ref, b2_ref, o_ref, *, W, L):
    # x_ref : (1, Cin, L)        f32   one full image, spatial flattened (L = H*W)
    # m_ref : (9, 1, L)          f32   per-tap 0/1 validity masks (zero padding)
    # w1_ref: (9, Cout, Cin)     f32   BN1-scale-folded conv1 weights, per tap
    # b1_ref: (Cout, 1)          f32   folded BN1 bias
    # w2_ref: (9, Cout, Cout)    f32   BN2-scale-folded conv2 weights, per tap
    # b2_ref: (Cout, 1)          f32   folded BN2 bias
    # o_ref : (1, Cout, L)       f32
    x = x_ref[0]                                     # (Cin, L) f32

    def conv3x3(inp, w_ref):
        # inp: (Cin', L); w_ref: (9, Cout, Cin') -> (Cout, L) f32
        acc = None
        for dy in range(3):
            for dx in range(3):
                k = dy * 3 + dx
                off = (dy - 1) * W + (dx - 1)        # flattened neighbor offset
                s = (-off) % L                       # roll amount (static)
                xs = inp if s == 0 else pltpu.roll(inp, shift=s, axis=1)
                xs = xs * m_ref[k]                   # kill wrapped / out-of-image taps
                t = jnp.dot(w_ref[k], xs,
                            preferred_element_type=jnp.float32,
                            precision=lax.Precision.HIGHEST)
                acc = t if acc is None else acc + t
        return acc

    # conv1 + BN1 bias + ReLU (all f32)
    y1 = jnp.maximum(conv3x3(x, w1_ref) + b1_ref[...], 0.0)     # (Cout, L)
    # conv2 + BN2 bias
    y2 = conv3x3(y1, w2_ref) + b2_ref[...]                      # (Cout, L)
    # residual add in f32 straight from the DMA'd input (no bf16 round-trip)
    o_ref[0] = (y2 + x).astype(o_ref.dtype)


def residual_block_pallas(x_nchw, w1_oihw, bn1, w2_oihw, bn2, eps=1e-5):
    """ResidualBlock forward (stride=1, dilation=1, padding=1, downsample=None).

    x_nchw : (N, C, H, W) float32
    w*_oihw: (Cout, Cin, 3, 3) conv weights (bias-free, like convbn_2d)
    bn*    : dict with gamma, beta, mean, var, each (Cout,)
    returns (N, Cout, H, W) float32
    """
    N, C, H, W = x_nchw.shape
    Cout = w1_oihw.shape[0]
    assert Cout == C, "residual add requires in_features == out_features (no downsample)"
    # TODO(synk): stride>1 / dilation>1 / downsample paths are not implemented
    # (module defaults stride=1, dilation=1, downsample=None are what this covers).
    L = H * W
    # TODO(synk): images whose (C, H*W) tile does not fit VMEM would need row
    # tiling with halos; small feature-extractor maps fit comfortably.
    assert 2 * (C * L * 4) <= 8 * 1024 * 1024, "image tile too large for this kernel"

    # Free reshape (no transpose / pad / gather): spatial flattened onto the lane axis.
    x_flat = x_nchw.astype(jnp.float32).reshape(N, C, L)

    # ---- fold inference BatchNorm scale into the conv weights; keep bias separate ----
    def fold(w, bn):
        scale = (bn["gamma"] / jnp.sqrt(bn["var"] + eps)).astype(jnp.float32)
        bias = (bn["beta"] - bn["mean"] * scale).astype(jnp.float32)
        wf = w.astype(jnp.float32) * scale[:, None, None, None]          # (O, I, 3, 3)
        w_taps = jnp.transpose(wf, (2, 3, 0, 1)).reshape(9, w.shape[0], w.shape[1])
        return w_taps, bias.reshape(-1, 1)

    w1t, b1 = fold(w1_oihw, bn1)
    w2t, b2 = fold(w2_oihw, bn2)

    # ---- per-tap 0/1 validity masks: emulate zero padding and cancel roll wrap ----
    q = jnp.arange(L)
    row, col = q // W, q % W
    masks = []
    for dy in range(3):
        for dx in range(3):
            oy, ox = dy - 1, dx - 1
            m = (row + oy >= 0) & (row + oy < H) & (col + ox >= 0) & (col + ox < W)
            masks.append(m)
    mask9 = jnp.stack(masks).astype(jnp.float32).reshape(9, 1, L)

    kernel = functools.partial(_resblock_kernel, W=W, L=L)

    out_flat = pl.pallas_call(
        kernel,
        out_shape=jax.ShapeDtypeStruct((N, Cout, L), jnp.float32),
        grid_spec=pltpu.PrefetchScalarGridSpec(
            num_scalar_prefetch=0,
            grid=(N,),
            in_specs=[
                pl.BlockSpec((1, C, L),        lambda b: (b, 0, 0)),
                pl.BlockSpec((9, 1, L),        lambda b: (0, 0, 0)),
                pl.BlockSpec((9, Cout, C),     lambda b: (0, 0, 0)),
                pl.BlockSpec((Cout, 1),        lambda b: (0, 0)),
                pl.BlockSpec((9, Cout, Cout),  lambda b: (0, 0, 0)),
                pl.BlockSpec((Cout, 1),        lambda b: (0, 0)),
            ],
            out_specs=pl.BlockSpec((1, Cout, L), lambda b: (b, 0, 0)),
        ),
        compiler_params=pltpu.CompilerParams(
            dimension_semantics=("parallel",),
        ),
    )(x_flat, mask9, w1t, b1, w2t, b2)

    # Free reshape back to NCHW — no transpose pass.
    return out_flat.reshape(N, Cout, H, W)


def _reference_forward(x_nchw, w1, bn1, w2, bn2, eps=1e-5):
    """Plain-JAX f32 reference (lax conv, NCHW) mirroring the PyTorch module."""
    def convbn(x, w, bn):
        y = lax.conv_general_dilated(
            x, w, window_strides=(1, 1), padding=((1, 1), (1, 1)),
            dimension_numbers=("NCHW", "OIHW", "NCHW"),
            precision=lax.Precision.HIGHEST)
        scale = bn["gamma"] / jnp.sqrt(bn["var"] + eps)
        bias = bn["beta"] - bn["mean"] * scale
        return y * scale[None, :, None, None] + bias[None, :, None, None]

    out = jnp.maximum(convbn(x_nchw, w1, bn1), 0.0)
    out = convbn(out, w2, bn2)
    return out + x_nchw


if __name__ == "__main__":
    key = jax.random.PRNGKey(0)
    N, C, H, W = 2, 8, 16, 16          # in_features == out_features, stride=1
    Cout = C                            # H*W = 256 -> lane-dense output blocks

    ks = jax.random.split(key, 11)
    x = jax.random.normal(ks[0], (N, C, H, W), jnp.float32)
    w1 = jax.random.normal(ks[1], (Cout, C, 3, 3), jnp.float32) * 0.1
    w2 = jax.random.normal(ks[2], (Cout, Cout, 3, 3), jnp.float32) * 0.1
    bn1 = dict(gamma=jax.random.normal(ks[3], (Cout,)) * 0.1 + 1.0,
               beta=jax.random.normal(ks[4], (Cout,)) * 0.1,
               mean=jax.random.normal(ks[5], (Cout,)) * 0.1,
               var=jnp.abs(jax.random.normal(ks[6], (Cout,))) * 0.1 + 1.0)
    bn2 = dict(gamma=jax.random.normal(ks[7], (Cout,)) * 0.1 + 1.0,
               beta=jax.random.normal(ks[8], (Cout,)) * 0.1,
               mean=jax.random.normal(ks[9], (Cout,)) * 0.1,
               var=jnp.abs(jax.random.normal(ks[10], (Cout,))) * 0.1 + 1.0)

    fwd = jax.jit(residual_block_pallas)
    out = jax.block_until_ready(fwd(x, w1, bn1, w2, bn2))
    ref = jax.block_until_ready(_reference_forward(x, w1, bn1, w2, bn2))

    assert out.shape == (N, Cout, H, W)
    max_err = float(jnp.max(jnp.abs(out - ref)))
    # All-f32 path with HIGHEST-precision matmuls -> tight tolerance.
    assert jnp.allclose(out, ref, atol=2e-3, rtol=2e-3), max_err

    print("KERNEL_OK")
</pallas_src>

<mosaic_0001>
module attributes {stable_mosaic.version = 11 : i64} {
  func.func @_resblock_kernel(%arg0: i32, %arg1: memref<1x8x256xf32, #tpu.memory_space<vmem>>, %arg2: memref<9x1x256xf32, #tpu.memory_space<vmem>>, %arg3: memref<9x8x8xf32, #tpu.memory_space<vmem>>, %arg4: memref<8x1xf32, #tpu.memory_space<vmem>>, %arg5: memref<9x8x8xf32, #tpu.memory_space<vmem>>, %arg6: memref<8x1xf32, #tpu.memory_space<vmem>>, %arg7: memref<1x8x256xf32, #tpu.memory_space<vmem>>) attributes {dimension_semantics = [#tpu.dimension_semantics<parallel>], iteration_bounds = array<i64: 2>, scalar_prefetch = 0 : i64, scratch_operands = 0 : i64, tpu.core_type = #tpu.core_type<tc>, window_params = [{transform_indices = @transform_0, window_bounds = array<i64: 1, 8, 256>}, {pipeline_mode = #tpu.pipeline_mode<synchronous>, transform_indices = @transform_1, window_bounds = array<i64: 9, 1, 256>}, {pipeline_mode = #tpu.pipeline_mode<synchronous>, transform_indices = @transform_2, window_bounds = array<i64: 9, 8, 8>}, {pipeline_mode = #tpu.pipeline_mode<synchronous>, transform_indices = @transform_3, window_bounds = array<i64: 8, 1>}, {pipeline_mode = #tpu.pipeline_mode<synchronous>, transform_indices = @transform_4, window_bounds = array<i64: 9, 8, 8>}, {pipeline_mode = #tpu.pipeline_mode<synchronous>, transform_indices = @transform_5, window_bounds = array<i64: 8, 1>}, {transform_indices = @transform_6, window_bounds = array<i64: 1, 8, 256>}]} {
    %c0 = arith.constant 0 : index
    %c0_0 = arith.constant 0 : index
    %c0_1 = arith.constant 0 : index
    %0 = vector.load %arg1[%c0, %c0_0, %c0_1] : memref<1x8x256xf32, #tpu.memory_space<vmem>>, vector<1x8x256xf32>
    %1 = vector.shape_cast %0 : vector<1x8x256xf32> to vector<8x256xf32>
    %c17_i32 = arith.constant 17 : i32
    %2 = tpu.dynamic_rotate %1 by %c17_i32 dim 1 : vector<8x256xf32>, i32 -> vector<8x256xf32>
    %c0_2 = arith.constant 0 : index
    %c0_3 = arith.constant 0 : index
    %c0_4 = arith.constant 0 : index
    %3 = vector.load %arg2[%c0_2, %c0_3, %c0_4] : memref<9x1x256xf32, #tpu.memory_space<vmem>>, vector<1x1x256xf32>
    %4 = vector.shape_cast %3 : vector<1x1x256xf32> to vector<1x256xf32>
    %5 = vector.broadcast %4 : vector<1x256xf32> to vector<8x256xf32>
    %6 = arith.mulf %2, %5 : vector<8x256xf32>
    %c0_5 = arith.constant 0 : index
    %c0_6 = arith.constant 0 : index
    %c0_7 = arith.constant 0 : index
    %7 = vector.load %arg3[%c0_5, %c0_6, %c0_7] : memref<9x8x8xf32, #tpu.memory_space<vmem>>, vector<1x8x8xf32>
    %8 = vector.shape_cast %7 : vector<1x8x8xf32> to vector<8x8xf32>
    %cst = arith.constant dense<0.000000e+00> : vector<8x256xf32>
    %9 = tpu.matmul %8, %6, %cst {dimension_numbers = #tpu.dot_dimension_numbers<[1], [0], [0], [1], [0, 0, 1, 1], [], []>, precision = #tpu.contract_precision<fp32>} : vector<8x8xf32>, vector<8x256xf32>, vector<8x256xf32> -> vector<8x256xf32>
    %c16_i32 = arith.constant 16 : i32
    %10 = tpu.dynamic_rotate %1 by %c16_i32 dim 1 : vector<8x256xf32>, i32 -> vector<8x256xf32>
    %c1 = arith.constant 1 : index
    %c0_8 = arith.constant 0 : index
    %c0_9 = arith.constant 0 : index
    %11 = vector.load %arg2[%c1, %c0_8, %c0_9] : memref<9x1x256xf32, #tpu.memory_space<vmem>>, vector<1x1x256xf32>
    %12 = vector.shape_cast %11 : vector<1x1x256xf32> to vector<1x256xf32>
    %13 = vector.broadcast %12 : vector<1x256xf32> to vector<8x256xf32>
    %14 = arith.mulf %10, %13 : vector<8x256xf32>
    %c1_10 = arith.constant 1 : index
    %c0_11 = arith.constant 0 : index
    %c0_12 = arith.constant 0 : index
    %15 = vector.load %arg3[%c1_10, %c0_11, %c0_12] : memref<9x8x8xf32, #tpu.memory_space<vmem>>, vector<1x8x8xf32>
    %16 = vector.shape_cast %15 : vector<1x8x8xf32> to vector<8x8xf32>
    %cst_13 = arith.constant dense<0.000000e+00> : vector<8x256xf32>
    %17 = tpu.matmul %16, %14, %cst_13 {dimension_numbers = #tpu.dot_dimension_numbers<[1], [0], [0], [1], [0, 0, 1, 1], [], []>, precision = #tpu.contract_precision<fp32>} : vector<8x8xf32>, vector<8x256xf32>, vector<8x256xf32> -> vector<8x256xf32>
    %18 = arith.addf %9, %17 : vector<8x256xf32>
    %c15_i32 = arith.constant 15 : i32
    %19 = tpu.dynamic_rotate %1 by %c15_i32 dim 1 : vector<8x256xf32>, i32 -> vector<8x256xf32>
    %c2 = arith.constant 2 : index
    %c0_14 = arith.constant 0 : index
    %c0_15 = arith.constant 0 : index
    %20 = vector.load %arg2[%c2, %c0_14, %c0_15] : memref<9x1x256xf32, #tpu.memory_space<vmem>>, vector<1x1x256xf32>
    %21 = vector.shape_cast %20 : vector<1x1x256xf32> to vector<1x256xf32>
    %22 = vector.broadcast %21 : vector<1x256xf32> to vector<8x256xf32>
    %23 = arith.mulf %19, %22 : vector<8x256xf32>
    %c2_16 = arith.constant 2 : index
    %c0_17 = arith.constant 0 : index
    %c0_18 = arith.constant 0 : index
    %24 = vector.load %arg3[%c2_16, %c0_17, %c0_18] : memref<9x8x8xf32, #tpu.memory_space<vmem>>, vector<1x8x8xf32>
    %25 = vector.shape_cast %24 : vector<1x8x8xf32> to vector<8x8xf32>
    %cst_19 = arith.constant dense<0.000000e+00> : vector<8x256xf32>
    %26 = tpu.matmul %25, %23, %cst_19 {dimension_numbers = #tpu.dot_dimension_numbers<[1], [0], [0], [1], [0, 0, 1, 1], [], []>, precision = #tpu.contract_precision<fp32>} : vector<8x8xf32>, vector<8x256xf32>, vector<8x256xf32> -> vector<8x256xf32>
    %27 = arith.addf %18, %26 : vector<8x256xf32>
    %c1_i32 = arith.constant 1 : i32
    %28 = tpu.dynamic_rotate %1 by %c1_i32 dim 1 : vector<8x256xf32>, i32 -> vector<8x256xf32>
    %c3 = arith.constant 3 : index
    %c0_20 = arith.constant 0 : index
    %c0_21 = arith.constant 0 : index
    %29 = vector.load %arg2[%c3, %c0_20, %c0_21] : memref<9x1x256xf32, #tpu.memory_space<vmem>>, vector<1x1x256xf32>
    %30 = vector.shape_cast %29 : vector<1x1x256xf32> to vector<1x256xf32>
    %31 = vector.broadcast %30 : vector<1x256xf32> to vector<8x256xf32>
    %32 = arith.mulf %28, %31 : vector<8x256xf32>
    %c3_22 = arith.constant 3 : index
    %c0_23 = arith.constant 0 : index
    %c0_24 = arith.constant 0 : index
    %33 = vector.load %arg3[%c3_22, %c0_23, %c0_24] : memref<9x8x8xf32, #tpu.memory_space<vmem>>, vector<1x8x8xf32>
    %34 = vector.shape_cast %33 : vector<1x8x8xf32> to vector<8x8xf32>
    %cst_25 = arith.constant dense<0.000000e+00> : vector<8x256xf32>
    %35 = tpu.matmul %34, %32, %cst_25 {dimension_numbers = #tpu.dot_dimension_numbers<[1], [0], [0], [1], [0, 0, 1, 1], [], []>, precision = #tpu.contract_precision<fp32>} : vector<8x8xf32>, vector<8x256xf32>, vector<8x256xf32> -> vector<8x256xf32>
    %36 = arith.addf %27, %35 : vector<8x256xf32>
    %c4 = arith.constant 4 : index
    %c0_26 = arith.constant 0 : index
    %c0_27 = arith.constant 0 : index
    %37 = vector.load %arg2[%c4, %c0_26, %c0_27] : memref<9x1x256xf32, #tpu.memory_space<vmem>>, vector<1x1x256xf32>
    %38 = vector.shape_cast %37 : vector<1x1x256xf32> to vector<1x256xf32>
    %39 = vector.broadcast %38 : vector<1x256xf32> to vector<8x256xf32>
    %40 = arith.mulf %1, %39 : vector<8x256xf32>
    %c4_28 = arith.constant 4 : index
    %c0_29 = arith.constant 0 : index
    %c0_30 = arith.constant 0 : index
    %41 = vector.load %arg3[%c4_28, %c0_29, %c0_30] : memref<9x8x8xf32, #tpu.memory_space<vmem>>, vector<1x8x8xf32>
    %42 = vector.shape_cast %41 : vector<1x8x8xf32> to vector<8x8xf32>
    %cst_31 = arith.constant dense<0.000000e+00> : vector<8x256xf32>
    %43 = tpu.matmul %42, %40, %cst_31 {dimension_numbers = #tpu.dot_dimension_numbers<[1], [0], [0], [1], [0, 0, 1, 1], [], []>, precision = #tpu.contract_precision<fp32>} : vector<8x8xf32>, vector<8x256xf32>, vector<8x256xf32> -> vector<8x256xf32>
    %44 = arith.addf %36, %43 : vector<8x256xf32>
    %c255_i32 = arith.constant 255 : i32
    %45 = tpu.dynamic_rotate %1 by %c255_i32 dim 1 : vector<8x256xf32>, i32 -> vector<8x256xf32>
    %c5 = arith.constant 5 : index
    %c0_32 = arith.constant 0 : index
    %c0_33 = arith.constant 0 : index
    %46 = vector.load %arg2[%c5, %c0_32, %c0_33] : memref<9x1x256xf32, #tpu.memory_space<vmem>>, vector<1x1x256xf32>
    %47 = vector.shape_cast %46 : vector<1x1x256xf32> to vector<1x256xf32>
    %48 = vector.broadcast %47 : vector<1x256xf32> to vector<8x256xf32>
    %49 = arith.mulf %45, %48 : vector<8x256xf32>
    %c5_34 = arith.constant 5 : index
    %c0_35 = arith.constant 0 : index
    %c0_36 = arith.constant 0 : index
    %50 = vector.load %arg3[%c5_34, %c0_35, %c0_36] : memref<9x8x8xf32, #tpu.memory_space<vmem>>, vector<1x8x8xf32>
    %51 = vector.shape_cast %50 : vector<1x8x8xf32> to vector<8x8xf32>
    %cst_37 = arith.constant dense<0.000000e+00> : vector<8x256xf32>
    %52 = tpu.matmul %51, %49, %cst_37 {dimension_numbers = #tpu.dot_dimension_numbers<[1], [0], [0], [1], [0, 0, 1, 1], [], []>, precision = #tpu.contract_precision<fp32>} : vector<8x8xf32>, vector<8x256xf32>, vector<8x256xf32> -> vector<8x256xf32>
    %53 = arith.addf %44, %52 : vector<8x256xf32>
    %c241_i32 = arith.constant 241 : i32
    %54 = tpu.dynamic_rotate %1 by %c241_i32 dim 1 : vector<8x256xf32>, i32 -> vector<8x256xf32>
    %c6 = arith.constant 6 : index
    %c0_38 = arith.constant 0 : index
    %c0_39 = arith.constant 0 : index
    %55 = vector.load %arg2[%c6, %c0_38, %c0_39] : memref<9x1x256xf32, #tpu.memory_space<vmem>>, vector<1x1x256xf32>
    %56 = vector.shape_cast %55 : vector<1x1x256xf32> to vector<1x256xf32>
    %57 = vector.broadcast %56 : vector<1x256xf32> to vector<8x256xf32>
    %58 = arith.mulf %54, %57 : vector<8x256xf32>
    %c6_40 = arith.constant 6 : index
    %c0_41 = arith.constant 0 : index
    %c0_42 = arith.constant 0 : index
    %59 = vector.load %arg3[%c6_40, %c0_41, %c0_42] : memref<9x8x8xf32, #tpu.memory_space<vmem>>, vector<1x8x8xf32>
    %60 = vector.shape_cast %59 : vector<1x8x8xf32> to vector<8x8xf32>
    %cst_43 = arith.constant dense<0.000000e+00> : vector<8x256xf32>
    %61 = tpu.matmul %60, %58, %cst_43 {dimension_numbers = #tpu.dot_dimension_numbers<[1], [0], [0], [1], [0, 0, 1, 1], [], []>, precision = #tpu.contract_precision<fp32>} : vector<8x8xf32>, vector<8x256xf32>, vector<8x256xf32> -> vector<8x256xf32>
    %62 = arith.addf %53, %61 : vector<8x256xf32>
    %c240_i32 = arith.constant 240 : i32
    %63 = tpu.dynamic_rotate %1 by %c240_i32 dim 1 : vector<8x256xf32>, i32 -> vector<8x256xf32>
    %c7 = arith.constant 7 : index
    %c0_44 = arith.constant 0 : index
    %c0_45 = arith.constant 0 : index
    %64 = vector.load %arg2[%c7, %c0_44, %c0_45] : memref<9x1x256xf32, #tpu.memory_space<vmem>>, vector<1x1x256xf32>
    %65 = vector.shape_cast %64 : vector<1x1x256xf32> to vector<1x256xf32>
    %66 = vector.broadcast %65 : vector<1x256xf32> to vector<8x256xf32>
    %67 = arith.mulf %63, %66 : vector<8x256xf32>
    %c7_46 = arith.constant 7 : index
    %c0_47 = arith.constant 0 : index
    %c0_48 = arith.constant 0 : index
    %68 = vector.load %arg3[%c7_46, %c0_47, %c0_48] : memref<9x8x8xf32, #tpu.memory_space<vmem>>, vector<1x8x8xf32>
    %69 = vector.shape_cast %68 : vector<1x8x8xf32> to vector<8x8xf32>
    %cst_49 = arith.constant dense<0.000000e+00> : vector<8x256xf32>
    %70 = tpu.matmul %69, %67, %cst_49 {dimension_numbers = #tpu.dot_dimension_numbers<[1], [0], [0], [1], [0, 0, 1, 1], [], []>, precision = #tpu.contract_precision<fp32>} : vector<8x8xf32>, vector<8x256xf32>, vector<8x256xf32> -> vector<8x256xf32>
    %71 = arith.addf %62, %70 : vector<8x256xf32>
    %c239_i32 = arith.constant 239 : i32
    %72 = tpu.dynamic_rotate %1 by %c239_i32 dim 1 : vector<8x256xf32>, i32 -> vector<8x256xf32>
    %c8 = arith.constant 8 : index
    %c0_50 = arith.constant 0 : index
    %c0_51 = arith.constant 0 : index
    %73 = vector.load %arg2[%c8, %c0_50, %c0_51] : memref<9x1x256xf32, #tpu.memory_space<vmem>>, vector<1x1x256xf32>
    %74 = vector.shape_cast %73 : vector<1x1x256xf32> to vector<1x256xf32>
    %75 = vector.broadcast %74 : vector<1x256xf32> to vector<8x256xf32>
    %76 = arith.mulf %72, %75 : vector<8x256xf32>
    %c8_52 = arith.constant 8 : index
    %c0_53 = arith.constant 0 : index
    %c0_54 = arith.constant 0 : index
    %77 = vector.load %arg3[%c8_52, %c0_53, %c0_54] : memref<9x8x8xf32, #tpu.memory_space<vmem>>, vector<1x8x8xf32>
    %78 = vector.shape_cast %77 : vector<1x8x8xf32> to vector<8x8xf32>
    %cst_55 = arith.constant dense<0.000000e+00> : vector<8x256xf32>
    %79 = tpu.matmul %78, %76, %cst_55 {dimension_numbers = #tpu.dot_dimension_numbers<[1], [0], [0], [1], [0, 0, 1, 1], [], []>, precision = #tpu.contract_precision<fp32>} : vector<8x8xf32>, vector<8x256xf32>, vector<8x256xf32> -> vector<8x256xf32>
    %80 = arith.addf %71, %79 : vector<8x256xf32>
    %c0_56 = arith.constant 0 : index
    %c0_57 = arith.constant 0 : index
    %81 = vector.load %arg4[%c0_56, %c0_57] : memref<8x1xf32, #tpu.memory_space<vmem>>, vector<8x1xf32>
    %82 = vector.broadcast %81 : vector<8x1xf32> to vector<8x256xf32>
    %83 = arith.addf %80, %82 : vector<8x256xf32>
    %cst_58 = arith.constant 0.000000e+00 : f32
    %84 = vector.broadcast %cst_58 : f32 to vector<8x256xf32>
    %85 = arith.maximumf %83, %84 : vector<8x256xf32>
    %c17_i32_59 = arith.constant 17 : i32
    %86 = tpu.dynamic_rotate %85 by %c17_i32_59 dim 1 : vector<8x256xf32>, i32 -> vector<8x256xf32>
    %c0_60 = arith.constant 0 : index
    %c0_61 = arith.constant 0 : index
    %c0_62 = arith.constant 0 : index
    %87 = vector.load %arg2[%c0_60, %c0_61, %c0_62] : memref<9x1x256xf32, #tpu.memory_space<vmem>>, vector<1x1x256xf32>
    %88 = vector.shape_cast %87 : vector<1x1x256xf32> to vector<1x256xf32>
    %89 = vector.broadcast %88 : vector<1x256xf32> to vector<8x256xf32>
    %90 = arith.mulf %86, %89 : vector<8x256xf32>
    %c0_63 = arith.constant 0 : index
    %c0_64 = arith.constant 0 : index
    %c0_65 = arith.constant 0 : index
    %91 = vector.load %arg5[%c0_63, %c0_64, %c0_65] : memref<9x8x8xf32, #tpu.memory_space<vmem>>, vector<1x8x8xf32>
    %92 = vector.shape_cast %91 : vector<1x8x8xf32> to vector<8x8xf32>
    %cst_66 = arith.constant dense<0.000000e+00> : vector<8x256xf32>
    %93 = tpu.matmul %92, %90, %cst_66 {dimension_numbers = #tpu.dot_dimension_numbers<[1], [0], [0], [1], [0, 0, 1, 1], [], []>, precision = #tpu.contract_precision<fp32>} : vector<8x8xf32>, vector<8x256xf32>, vector<8x256xf32> -> vector<8x256xf32>
    %c16_i32_67 = arith.constant 16 : i32
    %94 = tpu.dynamic_rotate %85 by %c16_i32_67 dim 1 : vector<8x256xf32>, i32 -> vector<8x256xf32>
    %c1_68 = arith.constant 1 : index
    %c0_69 = arith.constant 0 : index
    %c0_70 = arith.constant 0 : index
    %95 = vector.load %arg2[%c1_68, %c0_69, %c0_70] : memref<9x1x256xf32, #tpu.memory_space<vmem>>, vector<1x1x256xf32>
    %96 = vector.shape_cast %95 : vector<1x1x256xf32> to vector<1x256xf32>
    %97 = vector.broadcast %96 : vector<1x256xf32> to vector<8x256xf32>
    %98 = arith.mulf %94, %97 : vector<8x256xf32>
    %c1_71 = arith.constant 1 : index
    %c0_72 = arith.constant 0 : index
    %c0_73 = arith.constant 0 : index
    %99 = vector.load %arg5[%c1_71, %c0_72, %c0_73] : memref<9x8x8xf32, #tpu.memory_space<vmem>>, vector<1x8x8xf32>
    %100 = vector.shape_cast %99 : vector<1x8x8xf32> to vector<8x8xf32>
    %cst_74 = arith.constant dense<0.000000e+00> : vector<8x256xf32>
    %101 = tpu.matmul %100, %98, %cst_74 {dimension_numbers = #tpu.dot_dimension_numbers<[1], [0], [0], [1], [0, 0, 1, 1], [], []>, precision = #tpu.contract_precision<fp32>} : vector<8x8xf32>, vector<8x256xf32>, vector<8x256xf32> -> vector<8x256xf32>
    %102 = arith.addf %93, %101 : vector<8x256xf32>
    %c15_i32_75 = arith.constant 15 : i32
    %103 = tpu.dynamic_rotate %85 by %c15_i32_75 dim 1 : vector<8x256xf32>, i32 -> vector<8x256xf32>
    %c2_76 = arith.constant 2 : index
    %c0_77 = arith.constant 0 : index
    %c0_78 = arith.constant 0 : index
    %104 = vector.load %arg2[%c2_76, %c0_77, %c0_78] : memref<9x1x256xf32, #tpu.memory_space<vmem>>, vector<1x1x256xf32>
    %105 = vector.shape_cast %104 : vector<1x1x256xf32> to vector<1x256xf32>
    %106 = vector.broadcast %105 : vector<1x256xf32> to vector<8x256xf32>
    %107 = arith.mulf %103, %106 : vector<8x256xf32>
    %c2_79 = arith.constant 2 : index
    %c0_80 = arith.constant 0 : index
    %c0_81 = arith.constant 0 : index
    %108 = vector.load %arg5[%c2_79, %c0_80, %c0_81] : memref<9x8x8xf32, #tpu.memory_space<vmem>>, vector<1x8x8xf32>
    %109 = vector.shape_cast %108 : vector<1x8x8xf32> to vector<8x8xf32>
    %cst_82 = arith.constant dense<0.000000e+00> : vector<8x256xf32>
    %110 = tpu.matmul %109, %107, %cst_82 {dimension_numbers = #tpu.dot_dimension_numbers<[1], [0], [0], [1], [0, 0, 1, 1], [], []>, precision = #tpu.contract_precision<fp32>} : vector<8x8xf32>, vector<8x256xf32>, vector<8x256xf32> -> vector<8x256xf32>
    %111 = arith.addf %102, %110 : vector<8x256xf32>
    %c1_i32_83 = arith.constant 1 : i32
    %112 = tpu.dynamic_rotate %85 by %c1_i32_83 dim 1 : vector<8x256xf32>, i32 -> vector<8x256xf32>
    %c3_84 = arith.constant 3 : index
    %c0_85 = arith.constant 0 : index
    %c0_86 = arith.constant 0 : index
    %113 = vector.load %arg2[%c3_84, %c0_85, %c0_86] : memref<9x1x256xf32, #tpu.memory_space<vmem>>, vector<1x1x256xf32>
    %114 = vector.shape_cast %113 : vector<1x1x256xf32> to vector<1x256xf32>
    %115 = vector.broadcast %114 : vector<1x256xf32> to vector<8x256xf32>
    %116 = arith.mulf %112, %115 : vector<8x256xf32>
    %c3_87 = arith.constant 3 : index
    %c0_88 = arith.constant 0 : index
    %c0_89 = arith.constant 0 : index
    %117 = vector.load %arg5[%c3_87, %c0_88, %c0_89] : memref<9x8x8xf32, #tpu.memory_space<vmem>>, vector<1x8x8xf32>
    %118 = vector.shape_cast %117 : vector<1x8x8xf32> to vector<8x8xf32>
    %cst_90 = arith.constant dense<0.000000e+00> : vector<8x256xf32>
    %119 = tpu.matmul %118, %116, %cst_90 {dimension_numbers = #tpu.dot_dimension_numbers<[1], [0], [0], [1], [0, 0, 1, 1], [], []>, precision = #tpu.contract_precision<fp32>} : vector<8x8xf32>, vector<8x256xf32>, vector<8x256xf32> -> vector<8x256xf32>
    %120 = arith.addf %111, %119 : vector<8x256xf32>
    %c4_91 = arith.constant 4 : index
    %c0_92 = arith.constant 0 : index
    %c0_93 = arith.constant 0 : index
    %121 = vector.load %arg2[%c4_91, %c0_92, %c0_93] : memref<9x1x256xf32, #tpu.memory_space<vmem>>, vector<1x1x256xf32>
    %122 = vector.shape_cast %121 : vector<1x1x256xf32> to vector<1x256xf32>
    %123 = vector.broadcast %122 : vector<1x256xf32> to vector<8x256xf32>
    %124 = arith.mulf %85, %123 : vector<8x256xf32>
    %c4_94 = arith.constant 4 : index
    %c0_95 = arith.constant 0 : index
    %c0_96 = arith.constant 0 : index
    %125 = vector.load %arg5[%c4_94, %c0_95, %c0_96] : memref<9x8x8xf32, #tpu.memory_space<vmem>>, vector<1x8x8xf32>
    %126 = vector.shape_cast %125 : vector<1x8x8xf32> to vector<8x8xf32>
    %cst_97 = arith.constant dense<0.000000e+00> : vector<8x256xf32>
    %127 = tpu.matmul %126, %124, %cst_97 {dimension_numbers = #tpu.dot_dimension_numbers<[1], [0], [0], [1], [0, 0, 1, 1], [], []>, precision = #tpu.contract_precision<fp32>} : vector<8x8xf32>, vector<8x256xf32>, vector<8x256xf32> -> vector<8x256xf32>
    %128 = arith.addf %120, %127 : vector<8x256xf32>
    %c255_i32_98 = arith.constant 255 : i32
    %129 = tpu.dynamic_rotate %85 by %c255_i32_98 dim 1 : vector<8x256xf32>, i32 -> vector<8x256xf32>
    %c5_99 = arith.constant 5 : index
    %c0_100 = arith.constant 0 : index
    %c0_101 = arith.constant 0 : index
    %130 = vector.load %arg2[%c5_99, %c0_100, %c0_101] : memref<9x1x256xf32, #tpu.memory_space<vmem>>, vector<1x1x256xf32>
    %131 = vector.shape_cast %130 : vector<1x1x256xf32> to vector<1x256xf32>
    %132 = vector.broadcast %131 : vector<1x256xf32> to vector<8x256xf32>
    %133 = arith.mulf %129, %132 : vector<8x256xf32>
    %c5_102 = arith.constant 5 : index
    %c0_103 = arith.constant 0 : index
    %c0_104 = arith.constant 0 : index
    %134 = vector.load %arg5[%c5_102, %c0_103, %c0_104] : memref<9x8x8xf32, #tpu.memory_space<vmem>>, vector<1x8x8xf32>
    %135 = vector.shape_cast %134 : vector<1x8x8xf32> to vector<8x8xf32>
    %cst_105 = arith.constant dense<0.000000e+00> : vector<8x256xf32>
    %136 = tpu.matmul %135, %133, %cst_105 {dimension_numbers = #tpu.dot_dimension_numbers<[1], [0], [0], [1], [0, 0, 1, 1], [], []>, precision = #tpu.contract_precision<fp32>} : vector<8x8xf32>, vector<8x256xf32>, vector<8x256xf32> -> vector<8x256xf32>
    %137 = arith.addf %128, %136 : vector<8x256xf32>
    %c241_i32_106 = arith.constant 241 : i32
    %138 = tpu.dynamic_rotate %85 by %c241_i32_106 dim 1 : vector<8x256xf32>, i32 -> vector<8x256xf32>
    %c6_107 = arith.constant 6 : index
    %c0_108 = arith.constant 0 : index
    %c0_109 = arith.constant 0 : index
    %139 = vector.load %arg2[%c6_107, %c0_108, %c0_109] : memref<9x1x256xf32, #tpu.memory_space<vmem>>, vector<1x1x256xf32>
    %140 = vector.shape_cast %139 : vector<1x1x256xf32> to vector<1x256xf32>
    %141 = vector.broadcast %140 : vector<1x256xf32> to vector<8x256xf32>
    %142 = arith.mulf %138, %141 : vector<8x256xf32>
    %c6_110 = arith.constant 6 : index
    %c0_111 = arith.constant 0 : index
    %c0_112 = arith.constant 0 : index
    %143 = vector.load %arg5[%c6_110, %c0_111, %c0_112] : memref<9x8x8xf32, #tpu.memory_space<vmem>>, vector<1x8x8xf32>
    %144 = vector.shape_cast %143 : vector<1x8x8xf32> to vector<8x8xf32>
    %cst_113 = arith.constant dense<0.000000e+00> : vector<8x256xf32>
    %145 = tpu.matmul %144, %142, %cst_113 {dimension_numbers = #tpu.dot_dimension_numbers<[1], [0], [0], [1], [0, 0, 1, 1], [], []>, precision = #tpu.contract_precision<fp32>} : vector<8x8xf32>, vector<8x256xf32>, vector<8x256xf32> -> vector<8x256xf32>
    %146 = arith.addf %137, %145 : vector<8x256xf32>
    %c240_i32_114 = arith.constant 240 : i32
    %147 = tpu.dynamic_rotate %85 by %c240_i32_114 dim 1 : vector<8x256xf32>, i32 -> vector<8x256xf32>
    %c7_115 = arith.constant 7 : index
    %c0_116 = arith.constant 0 : index
    %c0_117 = arith.constant 0 : index
    %148 = vector.load %arg2[%c7_115, %c0_116, %c0_117] : memref<9x1x256xf32, #tpu.memory_space<vmem>>, vector<1x1x256xf32>
    %149 = vector.shape_cast %148 : vector<1x1x256xf32> to vector<1x256xf32>
    %150 = vector.broadcast %149 : vector<1x256xf32> to vector<8x256xf32>
    %151 = arith.mulf %147, %150 : vector<8x256xf32>
    %c7_118 = arith.constant 7 : index
    %c0_119 = arith.constant 0 : index
    %c0_120 = arith.constant 0 : index
    %152 = vector.load %arg5[%c7_118, %c0_119, %c0_120] : memref<9x8x8xf32, #tpu.memory_space<vmem>>, vector<1x8x8xf32>
    %153 = vector.shape_cast %152 : vector<1x8x8xf32> to vector<8x8xf32>
    %cst_121 = arith.constant dense<0.000000e+00> : vector<8x256xf32>
    %154 = tpu.matmul %153, %151, %cst_121 {dimension_numbers = #tpu.dot_dimension_numbers<[1], [0], [0], [1], [0, 0, 1, 1], [], []>, precision = #tpu.contract_precision<fp32>} : vector<8x8xf32>, vector<8x256xf32>, vector<8x256xf32> -> vector<8x256xf32>
    %155 = arith.addf %146, %154 : vector<8x256xf32>
    %c239_i32_122 = arith.constant 239 : i32
    %156 = tpu.dynamic_rotate %85 by %c239_i32_122 dim 1 : vector<8x256xf32>, i32 -> vector<8x256xf32>
    %c8_123 = arith.constant 8 : index
    %c0_124 = arith.constant 0 : index
    %c0_125 = arith.constant 0 : index
    %157 = vector.load %arg2[%c8_123, %c0_124, %c0_125] : memref<9x1x256xf32, #tpu.memory_space<vmem>>, vector<1x1x256xf32>
    %158 = vector.shape_cast %157 : vector<1x1x256xf32> to vector<1x256xf32>
    %159 = vector.broadcast %158 : vector<1x256xf32> to vector<8x256xf32>
    %160 = arith.mulf %156, %159 : vector<8x256xf32>
    %c8_126 = arith.constant 8 : index
    %c0_127 = arith.constant 0 : index
    %c0_128 = arith.constant 0 : index
    %161 = vector.load %arg5[%c8_126, %c0_127, %c0_128] : memref<9x8x8xf32, #tpu.memory_space<vmem>>, vector<1x8x8xf32>
    %162 = vector.shape_cast %161 : vector<1x8x8xf32> to vector<8x8xf32>
    %cst_129 = arith.constant dense<0.000000e+00> : vector<8x256xf32>
    %163 = tpu.matmul %162, %160, %cst_129 {dimension_numbers = #tpu.dot_dimension_numbers<[1], [0], [0], [1], [0, 0, 1, 1], [], []>, precision = #tpu.contract_precision<fp32>} : vector<8x8xf32>, vector<8x256xf32>, vector<8x256xf32> -> vector<8x256xf32>
    %164 = arith.addf %155, %163 : vector<8x256xf32>
    %c0_130 = arith.constant 0 : index
    %c0_131 = arith.constant 0 : index
    %165 = vector.load %arg6[%c0_130, %c0_131] : memref<8x1xf32, #tpu.memory_space<vmem>>, vector<8x1xf32>
    %166 = vector.broadcast %165 : vector<8x1xf32> to vector<8x256xf32>
    %167 = arith.addf %164, %166 : vector<8x256xf32>
    %168 = arith.addf %167, %1 : vector<8x256xf32>
    %c0_132 = arith.constant 0 : index
    %c0_133 = arith.constant 0 : index
    %c0_134 = arith.constant 0 : index
    %169 = vector.load %arg7[%c0_132, %c0_133, %c0_134] : memref<1x8x256xf32, #tpu.memory_space<vmem>>, vector<1x8x256xf32>
    %170 = vector.shape_cast %169 : vector<1x8x256xf32> to vector<8x256xf32>
    %171 = vector.shape_cast %168 : vector<8x256xf32> to vector<1x8x256xf32>
    tpu.vector_store %arg7[%c0_132, %c0_133, %c0_134], %171 {strides = array<i32>} : memref<1x8x256xf32, #tpu.memory_space<vmem>>, vector<1x8x256xf32>,
    return
  }
  func.func @transform_0(%arg0: i32) -> (i32, i32, i32) {
    %c0_i32 = arith.constant 0 : i32
    %c0_i32_0 = arith.constant 0 : i32
    %c0_i32_1 = arith.constant 0 : i32
    return %arg0, %c0_i32, %c0_i32_0 : i32, i32, i32
  }
  func.func @transform_1(%arg0: i32) -> (i32, i32, i32) {
    %c0_i32 = arith.constant 0 : i32
    %c0_i32_0 = arith.constant 0 : i32
    %c0_i32_1 = arith.constant 0 : i32
    %c0_i32_2 = arith.constant 0 : i32
    return %c0_i32, %c0_i32_0, %c0_i32_1 : i32, i32, i32
  }
  func.func @transform_2(%arg0: i32) -> (i32, i32, i32) {
    %c0_i32 = arith.constant 0 : i32
    %c0_i32_0 = arith.constant 0 : i32
    %c0_i32_1 = arith.constant 0 : i32
    %c0_i32_2 = arith.constant 0 : i32
    return %c0_i32, %c0_i32_0, %c0_i32_1 : i32, i32, i32
  }
  func.func @transform_3(%arg0: i32) -> (i32, i32) {
    %c0_i32 = arith.constant 0 : i32
    %c0_i32_0 = arith.constant 0 : i32
    %c0_i32_1 = arith.constant 0 : i32
    return %c0_i32, %c0_i32_0 : i32, i32
  }
  func.func @transform_4(%arg0: i32) -> (i32, i32, i32) {
    %c0_i32 = arith.constant 0 : i32
    %c0_i32_0 = arith.constant 0 : i32
    %c0_i32_1 = arith.constant 0 : i32
    %c0_i32_2 = arith.constant 0 : i32
    return %c0_i32, %c0_i32_0, %c0_i32_1 : i32, i32, i32
  }
  func.func @transform_5(%arg0: i32) -> (i32, i32) {
    %c0_i32 = arith.constant 0 : i32
    %c0_i32_0 = arith.constant 0 : i32
    %c0_i32_1 = arith.constant 0 : i32
    return %c0_i32, %c0_i32_0 : i32, i32
  }
  func.func @transform_6(%arg0: i32) -> (i32, i32, i32) {
    %c0_i32 = arith.constant 0 : i32
    %c0_i32_0 = arith.constant 0 : i32
    %c0_i32_1 = arith.constant 0 : i32
    return %arg0, %c0_i32, %c0_i32_0 : i32, i32, i32
  }
}

</mosaic_0001>

<bundles_post_ra>
// kernel: residual_block_pallas.1
= control target key start
LH: loop header
LB: loop body
LE: loop exit
PB: predicated region body
PF: predicated region fallthrough
CT: control target
= control target key end

     0   :  { %s9399_s21 = smov 0   ;;  %s9934_s0 = inlined_call_operand.vmem [shape: f32[2,8,256], index: 0, kind: input, shape index: {}]   ;;  %s9935_s1 = inlined_call_operand.vmem [shape: f32[9,1,256], index: 1, kind: input, shape index: {}]   ;;  %s9936_s2 = inlined_call_operand.vmem [shape: f32[9,8,8], index: 2, kind: input, shape index: {}]   ;;  %s9937_s3 = inlined_call_operand.vmem [shape: f32[8,1], index: 3, kind: input, shape index: {}]   ;;  %s9938_s4 = inlined_call_operand.vmem [shape: f32[9,8,8], index: 4, kind: input, shape index: {}]   ;;  %s9939_s5 = inlined_call_operand.vmem [shape: f32[8,1], index: 5, kind: input, shape index: {}]   ;;  %s9940_s6 = inlined_call_operand.vmem [shape: f32[2,8,256], index: 6, kind: output, shape index: {}]  }
   0x1 LB: > { %s9076_s22 = sadd.s32 4294967295, %s9352_s21   ;;  %p9080_p0 = scmp.ge.s32.totalorder %s9352_s21, 1  ;;  %s9352_s21 = sphi %s9399_s21, %s16_s21  }
   0x2   : > { %p212_p1 = scmp.lt.s32.totalorder %s9352_s21, 3 }
   0x4   : > { %p213_p2 = pnand %p9080_p0, %p212_p1 }
   0x5   : > { %p242_p3 = scmp.lt.s32.totalorder (!%p213_p2), %s9076_s22, 1  ;;  %v9354_v0 = vmov (!%p213_p2), 0.0   ;;  %s9355_s27 = smov (!%p213_p2), 16   ;;  %v9086_v3 = vld [vmem:[%s9936_s2 + $0x8] sm:$0xff] (!%p213_p2)  ;;  %vm302_vm0 = vcmask (!%p213_p2), 64512   ;;  %v258_v5 = vlaneseq (!%p213_p2)  ;;  %v277_v41 = vld [vmem:[%s9936_s2] sm:$0xff] (!%p213_p2) }
   0x6   : > { %216 = sbr.rel (%p213_p2) target bundleno = 1551 (0x60f), region = 44  ;;  %372 = vmatprep.mubr.f32.mxu0 (!%p213_p2), %v9354_v0  ;;  %4788 = vmatprep.mubr.f32.mxu1 (!%p213_p2), %v9354_v0  ;;  %s9356_s28 = smov (!%p213_p2), 17   ;;  %v304_v4 = vsel (!%p213_p2), %vm302_vm0, %v9086_v3, 0  ;;  %v9085_v12 = vld [vmem:[%s9935_s1 + $0x2] sm:$0x3] (!%p213_p2)  ;;  %v772_v44 = vsel (!%p213_p2), %vm302_vm0, %v277_v41, 0 }
   0x7   : > { %s9357_s29 = smov (!%p213_p2), 15   ;;  %s9358_s30 = smov (!%p213_p2), 1   ;;  %v9449_v6 = vand.u32 (!%p213_p2), 4294901760, %v304_v4  ;;  %v266_v7 = vshrl.u32 (!%p213_p2), %v258_v5, 7  ;;  %v9452_v9 = vand.u32 (!%p213_p2), 127, %v258_v5  ;;  %v9506_v47 = vand.u32 (!%p213_p2), 4294901760, %v772_v44 }
   0x8   : > { %s9359_s9 = smov (!%p213_p2), 127   ;;  %v263_v35 = vld [vmem:[%s9935_s1] sm:$0x3] (!%p213_p2)  ;;  %s9360_s16 = smov (!%p213_p2), 113   ;;  %v9087_v60 = vld [vmem:[%s9935_s1 + $0x4] sm:$0x3] (!%p213_p2) }
   0x9   : > { %v374_v8 = vsub.f32 (!%p213_p2), %v304_v4, %v9449_v6  ;;  %v9454_v10 = vsub.s32 (!%p213_p2), 0, %v266_v7  ;;  %v9456_v11 = vsub.s32 (!%p213_p2), 1, %v266_v7  ;;  %vm282_vm1 = vcmp.lt.s32.totalorder (!%p213_p2), %v9452_v9, 16  ;;  %s9361_s24 = smov (!%p213_p2), 112   ;;  %s9362_s11 = smov (!%p213_p2), 111  }
   0xa   : > { %vm260_vm2 = vcmp.lt.s32.totalorder (!%p213_p2), %v9452_v9, 17  ;;  %v842_v50 = vsub.f32 (!%p213_p2), %v772_v44, %v9506_v47  ;;  %vm1243_vm3 = vcmp.lt.s32.totalorder (!%p213_p2), %v9452_v9, 15  ;;  %vm1737_vm4 = vcmp.lt.s32.totalorder (!%p213_p2), %v9452_v9, 1 }
   0xb   : > { %v375_v14 = vand.u32 (!%p213_p2), 4294901760, %v374_v8  ;;  %v9463_v15 = vrot.slane (!%p213_p2), %v9085_v12, %v9454_v10  ;;  %v9466_v16 = vrot.slane (!%p213_p2), %v9085_v12, %v9456_v11  ;;  %v9482_v37 = vrot.slane (!%p213_p2), %v263_v35, %v9456_v11 }
   0xc   : > { %v9494_v42 = vrot.slane (!%p213_p2), %v263_v35, %v9454_v10  ;;  %v843_v53 = vand.u32 (!%p213_p2), 4294901760, %v842_v50  ;;  %v9523_v63 = vrot.slane (!%p213_p2), %v9087_v60, %v9456_v11  ;;  %v9530_v5 = vrot.slane (!%p213_p2), %v9087_v60, %v9454_v10 }
   0xd   : > { %s9942_s22 = smov (!%p242_p3, %s9076_s22), 1  ;;  %v376_v18 = vsub.f32 %v374_v8, %v375_v14  ;;  %vm2718_vm5 = vcmp.lt.s32.totalorder %v9452_v9, 127  ;;  %vm3212_vm6 = vcmp.lt.s32.totalorder %v9452_v9, 113  ;;  %vm3706_vm7 = vcmp.lt.s32.totalorder %v9452_v9, 112 }
   0xe   : > { %s9111_s23 = sshll.u32 %s9942_s22, 4  ;;  %v844_v56 = vsub.f32 %v842_v50, %v843_v53  ;;  %vm4200_vm8 = vcmp.lt.s32.totalorder %v9452_v9, 111 }
   0xf   : > { %s9417_s26 = scalar_lea.vmem %s9934_s0, %s9111_s23  ;;  %v377_v25 = vand.u32 4294901760, %v376_v18 }
  0x10   : > { %v9420_v1 = vld [vmem:[%s9417_s26] sm:$0xff]  ;;  %v9427_v2 = vld [vmem:[%s9417_s26 + $0x8] sm:$0xff]  ;;  %v845_v58 = vand.u32 4294901760, %v844_v56 }
  0x11   : > { %278 = vrot.lane.b32.xlu0 %v9420_v1, %s9355_s27  ;;  %254 = vrot.lane.b32.xlu1 %v9420_v1, %s9356_s28 }
  0x15   : > { %280 = vrot.lane.b32.xlu0 %v9427_v2, %s9355_s27  ;;  %256 = vrot.lane.b32.xlu1 %v9427_v2, %s9356_s28 }
  0x19   : > { %1241 = vrot.lane.b32.xlu1 %v9427_v2, %s9357_s29  ;;  %1239 = vrot.lane.b32.xlu0 %v9420_v1, %s9357_s29 }
  0x1d   : > { %1735 = vrot.lane.b32.xlu1 %v9427_v2, %s9358_s30  ;;  %1733 = vrot.lane.b32.xlu0 %v9420_v1, %s9358_s30 }
  0x21   : > { %2716 = vrot.lane.b32.xlu1 %v9427_v2, %s9359_s9  ;;  %2714 = vrot.lane.b32.xlu0 %v9420_v1, %s9359_s9 }
  0x25   : > { %3210 = vrot.lane.b32.xlu1 %v9427_v2, %s9360_s16  ;;  %3208 = vrot.lane.b32.xlu0 %v9420_v1, %s9360_s16 }
  0x29   : > { %3704 = vrot.lane.b32.xlu1 %v9427_v2, %s9361_s24  ;;  %3702 = vrot.lane.b32.xlu0 %v9420_v1, %s9361_s24 }
  0x2d   : > { %4198 = vrot.lane.b32.xlu1 %v9427_v2, %s9362_s11  ;;  %4196 = vrot.lane.b32.xlu0 %v9420_v1, %s9362_s11 }
  0x83   : > { %v279_v13 = vpop.permute.xlu0 %278  ;;  %v255_v34 = vpop.permute.xlu1 %254 }
  0x87   : > { %v281_v17 = vpop.permute.xlu0 %280  ;;  %v257_v36 = vpop.permute.xlu1 %256 }
  0x88   : > { %v283_v19 = vsel %vm282_vm1, %v279_v13, %v281_v17  ;;  %v284_v20 = vsel %vm282_vm1, %v281_v17, %v279_v13  ;;  %v261_v38 = vsel %vm260_vm2, %v255_v34, %v257_v36  ;;  %v262_v43 = vsel %vm260_vm2, %v257_v36, %v255_v34 }
  0x89   : > { %v298_v21 = vmul.f32 %v9463_v15, %v284_v20  ;;  %v299_v22 = vmul.f32 %v9466_v16, %v283_v19  ;;  %v276_v39 = vmul.f32 %v9482_v37, %v261_v38  ;;  %v275_v46 = vmul.f32 %v9494_v42, %v262_v43 }
  0x8b   : > { %v306_v23 = vand.u32 4294901760, %v299_v22  ;;  %v308_v24 = vand.u32 4294901760, %v298_v21  ;;  %v9488_v40 = vand.u32 4294901760, %v276_v39  ;;  %v776_v49 = vand.u32 4294901760, %v275_v46  ;;  %v1242_v61 = vpop.permute.xlu1 %1241  ;;  %v1240_v62 = vpop.permute.xlu0 %1239 }
  0x8c   : > { %v1244_v3 = vsel %vm1243_vm3, %v1240_v62, %v1242_v61 }
  0x8d   : > { %v385_v26 = vsub.f32 %v299_v22, %v306_v23  ;;  %v391_v27 = vsub.f32 %v298_v21, %v308_v24  ;;  %307 = vmatprep.subr.mxu0 %v306_v23  ;;  %v853_v45 = vsub.f32 %v276_v39, %v9488_v40  ;;  %v859_v52 = vsub.f32 %v275_v46, %v776_v49 }
  0x8e   : > { %309 = vmatpush1.msra.mxu0 %v308_v24  ;;  %v1260_v4 = vmul.f32 %v9523_v63, %v1244_v3  ;;  %v9092_v3 = vld [vmem:[%s9936_s2 + $0x20] sm:$0xff] }
  0x8f   : > { %v392_v28 = vand.u32 4294901760, %v391_v27  ;;  %378 = vmatmul.mubr.f32.vlgmr.msra.gmra.mrb[0].mxu0 %v377_v25  ;;  %v386_v29 = vand.u32 4294901760, %v385_v26  ;;  %v854_v48 = vand.u32 4294901760, %v853_v45  ;;  %v860_v55 = vand.u32 4294901760, %v859_v52 }
  0x90   : > { %458 = vmatprep.mubr.f32.mxu0 %v9354_v0  ;;  %v1266_v7 = vand.u32 4294901760, %v1260_v4 }
  0x91   : > { %v387_v30 = vsub.f32 %v385_v26, %v386_v29  ;;  %v393_v31 = vsub.f32 %v391_v27, %v392_v28  ;;  %v855_v51 = vsub.f32 %v853_v45, %v854_v48  ;;  %v861_v57 = vsub.f32 %v859_v52, %v860_v55 }
  0x93   : > { %v388_v32 = vand.u32 4294901760, %v387_v30  ;;  %v394_v33 = vand.u32 4294901760, %v393_v31  ;;  %v856_v54 = vand.u32 4294901760, %v855_v51  ;;  %v862_v59 = vand.u32 4294901760, %v861_v57  ;;  %v9089_v30 = vld [vmem:[%s9935_s1 + $0x6] sm:$0x3]  ;;  %v1736_v31 = vpop.permute.xlu1 %1735 }
  0x94   : > { %v9567_v36 = vrot.slane %v9089_v30, %v9454_v10 }
  0x95   : > { %389 = vmatprep.subr.mxu0 %v388_v32  ;;  %v1734_v32 = vpop.permute.xlu0 %1733 }
  0x96   : > { %395 = vmatpush1.msra.mxu0 %v394_v33  ;;  %v9560_v33 = vrot.slane %v9089_v30, %v9456_v11  ;;  %v1738_v34 = vsel %vm1737_vm4, %v1734_v32, %v1736_v31  ;;  %v1739_v38 = vsel %vm1737_vm4, %v1736_v31, %v1734_v32 }
  0x97   : > { %460 = vmatmul.mubr.f32.vlgmr.msra.gmra.mrb[0].mxu0 %v9449_v6  ;;  %468 = vmatprep.subr.mxu0 %v385_v26  ;;  %v1753_v41 = vmul.f32 %v9567_v36, %v1739_v38 }
  0x98   : > { %471 = vmatpush1.msra.mxu0 %v391_v27  ;;  %534 = vmatprep.mubr.f32.mxu0 %v9354_v0  ;;  %v1754_v35 = vmul.f32 %v9560_v33, %v1738_v34  ;;  %v9094_v34 = vld [vmem:[%s9936_s2 + $0x28] sm:$0xff] }
  0x99   : > { %544 = vmatprep.subr.mxu0 %v306_v23  ;;  %v1762_v46 = vand.u32 4294901760, %v1753_v41  ;;  %v2739_v38 = vsel %vm302_vm0, %v9094_v34, 0 }
  0x9a   : > { %v1760_v39 = vand.u32 4294901760, %v1754_v35 }
  0x9c   : > { %v1839_v44 = vsub.f32 %v1754_v35, %v1760_v39 }
  0x9f   : > { %537 = vmatmul.mubr.f32.vlgmr.msra.gmra.mrb[0].mxu0 %v374_v8  ;;  %v9088_v8 = vld [vmem:[%s9936_s2 + $0x10] sm:$0xff] }
  0xa0   : > { %546 = vmatpush1.msra.mxu0 %v308_v24  ;;  %609 = vmatprep.mubr.f32.mxu0 %v9354_v0  ;;  %v1264_v13 = vsel %vm302_vm0, %v9088_v8, 0 }
  0xa1   : > { %622 = vmatprep.subr.mxu0 %v386_v29  ;;  %v9545_v17 = vand.u32 4294901760, %v1264_v13 }
  0xa3   : > { %v1334_v20 = vsub.f32 %v1264_v13, %v9545_v17 }
  0xa7   : > { %613 = vmatmul.mubr.f32.vlgmr.msra.gmra.mrb[0].mxu0 %v375_v14  ;;  %v1345_v14 = vsub.f32 %v1260_v4, %v1266_v7 }
  0xa8   : > { %626 = vmatpush1.msra.mxu0 %v392_v28  ;;  %689 = vmatprep.mubr.f32.mxu0 %v9354_v0 }
  0xa9   : > { %698 = vmatprep.subr.mxu0 %v306_v23  ;;  %v1346_v19 = vand.u32 4294901760, %v1345_v14  ;;  %v1335_v23 = vand.u32 4294901760, %v1334_v20 }
  0xab   : > { %v1347_v22 = vsub.f32 %v1345_v14, %v1346_v19  ;;  %v1336_v26 = vsub.f32 %v1334_v20, %v1335_v23 }
  0xad   : > { %v1348_v25 = vand.u32 4294901760, %v1347_v22  ;;  %v1337_v28 = vand.u32 4294901760, %v1336_v26  ;;  %v2715_v26 = vpop.permute.xlu0 %2714 }
  0xaf   : > { %691 = vmatmul.mubr.f32.vlgmr.msra.gmra.mrb[0].mxu0 %v9449_v6 }
  0xb0   : > { %700 = vmatpush1.msra.mxu0 %v308_v24  ;;  %763 = vmatprep.mubr.f32.mxu0 %v9354_v0 }
  0xb1   : > { %775 = vmatprep.subr.mxu0 %v9488_v40 }
  0xb7   : > { %765 = vmatmul.mubr.f32.vlgmr.msra.gmra.mrb[0].mxu0 %v9449_v6  ;;  %v1245_v6 = vsel %vm1243_vm3, %v1242_v61, %v1240_v62 }
  0xb8   : > { %777 = vmatpush1.msra.mxu0 %v776_v49  ;;  %840 = vmatprep.mubr.f32.mxu0 %v9354_v0  ;;  %v1259_v12 = vmul.f32 %v9530_v5, %v1245_v6  ;;  %v2245_v6 = vsel %vm302_vm0, %v9092_v3, 0 }
  0xb9   : > { %857 = vmatprep.subr.mxu0 %v856_v54 }
  0xba   : > { %v1268_v18 = vand.u32 4294901760, %v1259_v12 }
  0xbc   : > { %v1351_v21 = vsub.f32 %v1259_v12, %v1268_v18 }
  0xbe   : > { %v1352_v24 = vand.u32 4294901760, %v1351_v21 }
  0xbf   : > { %846 = vmatmul.mubr.f32.vlgmr.msra.gmra.mrb[0].mxu0 %v845_v58  ;;  %v9091_v58 = vld [vmem:[%s9935_s1 + $0x8] sm:$0x3] }
  0xc0   : > { %863 = vmatpush1.msra.mxu0 %v862_v59  ;;  %926 = vmatprep.mubr.f32.mxu0 %v9354_v0  ;;  %v1353_v27 = vsub.f32 %v1351_v21, %v1352_v24  ;;  %v9591_v59 = vrot.slane %v9091_v58, %v9456_v11  ;;  %v9597_v61 = vrot.slane %v9091_v58, %v9454_v10 }
  0xc1   : > { %936 = vmatprep.subr.mxu0 %v853_v45 }
  0xc2   : > { %v1354_v29 = vand.u32 4294901760, %v1353_v27  ;;  %v2241_v60 = vmul.f32 %v9591_v59, %v9427_v2  ;;  %v2240_v4 = vmul.f32 %v9597_v61, %v9420_v1  ;;  %v9606_v2 = vand.u32 4294901760, %v2245_v6 }
  0xc4   : > { %v2247_v62 = vand.u32 4294901760, %v2241_v60  ;;  %v2249_v8 = vand.u32 4294901760, %v2240_v4  ;;  %v2315_v13 = vsub.f32 %v2245_v6, %v9606_v2  ;;  %v9096_v6 = vld [vmem:[%s9936_s2 + $0x30] sm:$0xff] }
  0xc7   : > { %928 = vmatmul.mubr.f32.vlgmr.msra.gmra.mrb[0].mxu0 %v9506_v47 }
  0xc8   : > { %939 = vmatpush1.msra.mxu0 %v859_v52  ;;  %1002 = vmatprep.mubr.f32.mxu0 %v9354_v0 }
  0xc9   : > { %1012 = vmatprep.subr.mxu0 %v9488_v40 }
  0xcf   : > { %1005 = vmatmul.mubr.f32.vlgmr.msra.gmra.mrb[0].mxu0 %v842_v50 }
  0xd0   : > { %1014 = vmatpush1.msra.mxu0 %v776_v49  ;;  %1077 = vmatprep.mubr.f32.mxu0 %v9354_v0 }
  0xd1   : > { %1090 = vmatprep.subr.mxu0 %v854_v48 }
  0xd7   : > { %1081 = vmatmul.mubr.f32.vlgmr.msra.gmra.mrb[0].mxu0 %v843_v53 }
  0xd8   : > { %1094 = vmatpush1.msra.mxu0 %v860_v55  ;;  %1157 = vmatprep.mubr.f32.mxu0 %v9354_v0 }
  0xd9   : > { %1166 = vmatprep.subr.mxu0 %v9488_v40  ;;  %v9090_v40 = vld [vmem:[%s9936_s2 + $0x18] sm:$0xff] }
  0xda   : > { %v1758_v43 = vsel %vm302_vm0, %v9090_v40, 0  ;;  %v9636_v40 = vand.u32 4294901760, %v2739_v38 }
  0xdb   : > { %v1827_v45 = vand.u32 4294901760, %v1758_v43 }
  0xdd   : > { %v1828_v48 = vsub.f32 %v1758_v43, %v1827_v45 }
  0xdf   : > { %1159 = vmatmul.mubr.f32.vlgmr.msra.gmra.mrb[0].mxu0 %v9506_v47  ;;  %v1829_v51 = vand.u32 4294901760, %v1828_v48 }
  0xe0   : > { %1168 = vmatpush1.msra.mxu0 %v776_v49  ;;  %1231 = vmatprep.mubr.f32.mxu0 %v9354_v0  ;;  %v1845_v49 = vsub.f32 %v1753_v41, %v1762_v46 }
  0xe1   : > { %1267 = vmatprep.subr.mxu0 %v1266_v7  ;;  %v1830_v54 = vsub.f32 %v1828_v48, %v1829_v51 }
  0xe2   : > { %v1846_v52 = vand.u32 4294901760, %v1845_v49 }
  0xe3   : > { %v1831_v56 = vand.u32 4294901760, %v1830_v54  ;;  %v9095_v54 = vld [vmem:[%s9935_s1 + $0xc] sm:$0x3] }
  0xe4   : > { %v1847_v55 = vsub.f32 %v1845_v49, %v1846_v52 }
  0xe6   : > { %v1848_v57 = vand.u32 4294901760, %v1847_v55 }
  0xe7   : > { %1233 = vmatmul.mubr.f32.vlgmr.msra.gmra.mrb[0].mxu0 %v9506_v47  ;;  %v1840_v47 = vand.u32 4294901760, %v1839_v44 }
  0xe8   : > { %1269 = vmatpush1.msra.mxu0 %v1268_v18  ;;  %1332 = vmatprep.mubr.f32.mxu0 %v9354_v0 }
  0xe9   : > { %1349 = vmatprep.subr.mxu0 %v1348_v25  ;;  %v1841_v50 = vsub.f32 %v1839_v44, %v1840_v47  ;;  %v2717_v25 = vpop.permute.xlu1 %2716 }
  0xea   : > { %v2719_v31 = vsel %vm2718_vm5, %v2715_v26, %v2717_v25 }
  0xeb   : > { %v1842_v53 = vand.u32 4294901760, %v1841_v50 }
  0xed   : > { %v3211_v55 = vpop.permute.xlu1 %3210 }
  0xef   : > { %1338 = vmatmul.mubr.f32.vlgmr.msra.gmra.mrb[0].mxu0 %v1337_v28  ;;  %v2720_v28 = vsel %vm2718_vm5, %v2717_v25, %v2715_v26  ;;  %v4690_v26 = vld [vmem:[%s9937_s3] sm:$0xff] }
  0xf0   : > { %1355 = vmatpush1.msra.mxu0 %v1354_v29  ;;  %1418 = vmatprep.mubr.f32.mxu0 %v9354_v0 }
  0xf1   : > { %1428 = vmatprep.subr.mxu0 %v1345_v14  ;;  %v2332_v14 = vsub.f32 %v2240_v4, %v2249_v8 }
  0xf7   : > { %1420 = vmatmul.mubr.f32.vlgmr.msra.gmra.mrb[0].mxu0 %v9545_v17 }
  0xf8   : > { %1431 = vmatpush1.msra.mxu0 %v1351_v21  ;;  %1494 = vmatprep.mubr.f32.mxu0 %v9354_v0 }
  0xf9   : > { %1504 = vmatprep.subr.mxu0 %v1266_v7 }
  0xff   : > { %1497 = vmatmul.mubr.f32.vlgmr.msra.gmra.mrb[0].mxu0 %v1334_v20 }
 0x100   : > { %1506 = vmatpush1.msra.mxu0 %v1268_v18  ;;  %1569 = vmatprep.mubr.f32.mxu0 %v9354_v0 }
 0x101   : > { %1582 = vmatprep.subr.mxu0 %v1346_v19  ;;  %v2333_v19 = vand.u32 4294901760, %v2332_v14 }
 0x103   : > { %v2334_v21 = vsub.f32 %v2332_v14, %v2333_v19 }
 0x107   : > { %1573 = vmatmul.mubr.f32.vlgmr.msra.gmra.mrb[0].mxu0 %v1335_v23  ;;  %v2335_v23 = vand.u32 4294901760, %v2334_v21 }
 0x108   : > { %1586 = vmatpush1.msra.mxu0 %v1352_v24  ;;  %1649 = vmatprep.mubr.f32.mxu0 %v9354_v0  ;;  %v9093_v24 = vld [vmem:[%s9935_s1 + $0xa] sm:$0x3] }
 0x109   : > { %1658 = vmatprep.subr.mxu0 %v1266_v7  ;;  %v2326_v7 = vsub.f32 %v2241_v60, %v2247_v62  ;;  %v9619_v27 = vrot.slane %v9093_v24, %v9456_v11  ;;  %v9626_v30 = vrot.slane %v9093_v24, %v9454_v10 }
 0x10b   : > { %v2327_v12 = vand.u32 4294901760, %v2326_v7  ;;  %v2735_v29 = vmul.f32 %v9619_v27, %v2720_v28  ;;  %v2734_v35 = vmul.f32 %v9626_v30, %v2719_v31  ;;  %v9363_v28 = vmov 0   ;;  %v3705_v31 = vpop.permute.xlu1 %3704 }
 0x10c   : > { %9343 = vset.pattern.permute.xlu0 %v9363_v28 }
 0x10d   : > { %v2741_v32 = vand.u32 4294901760, %v2735_v29  ;;  %v2743_v41 = vand.u32 4294901760, %v2734_v35  ;;  %4693 = vperm.xlu0 %9343, %v4690_v26  }
 0x10f   : > { %1651 = vmatmul.mubr.f32.vlgmr.msra.gmra.mrb[0].mxu0 %v9545_v17 }
 0x110   : > { %1660 = vmatpush1.msra.mxu0 %v1268_v18  ;;  %1723 = vmatprep.mubr.f32.mxu0 %v9354_v0  ;;  %v2316_v18 = vand.u32 4294901760, %v2315_v13 }
 0x111   : > { %1761 = vmatprep.subr.mxu0 %v1760_v39 }
 0x112   : > { %v2317_v20 = vsub.f32 %v2315_v13, %v2316_v18 }
 0x114   : > { %v2318_v22 = vand.u32 4294901760, %v2317_v20 }
 0x117   : > { %1725 = vmatmul.mubr.f32.vlgmr.msra.gmra.mrb[0].mxu0 %v9545_v17  ;;  %v2328_v17 = vsub.f32 %v2326_v7, %v2327_v12 }
 0x118   : > { %1763 = vmatpush1.msra.mxu0 %v1762_v46  ;;  %1826 = vmatprep.mubr.f32.mxu0 %v9354_v0 }
 0x119   : > { %1843 = vmatprep.subr.mxu0 %v1842_v53  ;;  %v2329_v1 = vand.u32 4294901760, %v2328_v17 }
 0x11f   : > { %1832 = vmatmul.mubr.f32.vlgmr.msra.gmra.mrb[0].mxu0 %v1831_v56  ;;  %v3209_v56 = vpop.permute.xlu0 %3208 }
 0x120   : > { %1849 = vmatpush1.msra.mxu0 %v1848_v57  ;;  %1912 = vmatprep.mubr.f32.mxu0 %v9354_v0  ;;  %v9651_v57 = vrot.slane %v9095_v54, %v9456_v11  ;;  %v3214_v58 = vsel %vm3212_vm6, %v3211_v55, %v3209_v56  ;;  %v3213_v3 = vsel %vm3212_vm6, %v3209_v56, %v3211_v55 }
 0x121   : > { %1922 = vmatprep.subr.mxu0 %v1839_v44  ;;  %v2809_v44 = vsub.f32 %v2739_v38, %v9636_v40 }
 0x122   : > { %v3229_v60 = vmul.f32 %v9651_v57, %v3214_v58 }
 0x124   : > { %v3235_v4 = vand.u32 4294901760, %v3229_v60 }
 0x127   : > { %1914 = vmatmul.mubr.f32.vlgmr.msra.gmra.mrb[0].mxu0 %v1827_v45 }
 0x128   : > { %1925 = vmatpush1.msra.mxu0 %v1845_v49  ;;  %1988 = vmatprep.mubr.f32.mxu0 %v9354_v0 }
 0x129   : > { %1998 = vmatprep.subr.mxu0 %v1760_v39 }
 0x12f   : > { %1991 = vmatmul.mubr.f32.vlgmr.msra.gmra.mrb[0].mxu0 %v1828_v48 }
 0x130   : > { %2000 = vmatpush1.msra.mxu0 %v1762_v46  ;;  %2063 = vmatprep.mubr.f32.mxu0 %v9354_v0 }
 0x131   : > { %2076 = vmatprep.subr.mxu0 %v1840_v47  ;;  %v2810_v47 = vand.u32 4294901760, %v2809_v44 }
 0x133   : > { %v2811_v50 = vsub.f32 %v2809_v44, %v2810_v47 }
 0x137   : > { %2067 = vmatmul.mubr.f32.vlgmr.msra.gmra.mrb[0].mxu0 %v1829_v51 }
 0x138   : > { %2080 = vmatpush1.msra.mxu0 %v1846_v52  ;;  %2143 = vmatprep.mubr.f32.mxu0 %v9354_v0  ;;  %v2812_v52 = vand.u32 4294901760, %v2811_v50 }
 0x139   : > { %2152 = vmatprep.subr.mxu0 %v1760_v39  ;;  %v2820_v39 = vsub.f32 %v2735_v29, %v2741_v32  ;;  %v9097_v29 = vld [vmem:[%s9935_s1 + $0xe] sm:$0x3] }
 0x13a   : > { %v9686_v34 = vrot.slane %v9097_v29, %v9456_v11 }
 0x13b   : > { %v2821_v43 = vand.u32 4294901760, %v2820_v39 }
 0x13f   : > { %2145 = vmatmul.mubr.f32.vlgmr.msra.gmra.mrb[0].mxu0 %v1827_v45 }
 0x140   : > { %2154 = vmatpush1.msra.mxu0 %v1762_v46  ;;  %2217 = vmatprep.mubr.f32.mxu0 %v9354_v0  ;;  %v2822_v46 = vsub.f32 %v2820_v39, %v2821_v43 }
 0x141   : > { %2248 = vmatprep.subr.mxu0 %v2247_v62 }
 0x142   : > { %v2823_v49 = vand.u32 4294901760, %v2822_v46 }
 0x147   : > { %2219 = vmatmul.mubr.f32.vlgmr.msra.gmra.mrb[0].mxu0 %v1827_v45  ;;  %v2826_v45 = vsub.f32 %v2734_v35, %v2743_v41 }
 0x148   : > { %2250 = vmatpush1.msra.mxu0 %v2249_v8  ;;  %2313 = vmatprep.mubr.f32.mxu0 %v9354_v0 }
 0x149   : > { %2330 = vmatprep.subr.mxu0 %v2329_v1  ;;  %v2827_v48 = vand.u32 4294901760, %v2826_v45 }
 0x14b   : > { %v2828_v51 = vsub.f32 %v2826_v45, %v2827_v48 }
 0x14d   : > { %v2829_v53 = vand.u32 4294901760, %v2828_v51 }
 0x14f   : > { %2319 = vmatmul.mubr.f32.vlgmr.msra.gmra.mrb[0].mxu0 %v2318_v22 }
 0x150   : > { %2336 = vmatpush1.msra.mxu0 %v2335_v23  ;;  %2399 = vmatprep.mubr.f32.mxu0 %v9354_v0 }
 0x151   : > { %2409 = vmatprep.subr.mxu0 %v2326_v7 }
 0x157   : > { %2401 = vmatmul.mubr.f32.vlgmr.msra.gmra.mrb[0].mxu0 %v9606_v2 }
 0x158   : > { %2412 = vmatpush1.msra.mxu0 %v2332_v14  ;;  %2475 = vmatprep.mubr.f32.mxu0 %v9354_v0 }
 0x159   : > { %2485 = vmatprep.subr.mxu0 %v2247_v62 }
 0x15f   : > { %2478 = vmatmul.mubr.f32.vlgmr.msra.gmra.mrb[0].mxu0 %v2315_v13 }
 0x160   : > { %2487 = vmatpush1.msra.mxu0 %v2249_v8  ;;  %2550 = vmatprep.mubr.f32.mxu0 %v9354_v0 }
 0x161   : > { %2563 = vmatprep.subr.mxu0 %v2327_v12 }
 0x167   : > { %2554 = vmatmul.mubr.f32.vlgmr.msra.gmra.mrb[0].mxu0 %v2316_v18 }
 0x168   : > { %2567 = vmatpush1.msra.mxu0 %v2333_v19  ;;  %2630 = vmatprep.mubr.f32.mxu0 %v9354_v0 }
 0x169   : > { %2639 = vmatprep.subr.mxu0 %v2247_v62  ;;  %v9658_v62 = vrot.slane %v9095_v54, %v9454_v10 }
 0x16b   : > { %v3228_v7 = vmul.f32 %v9658_v62, %v3213_v3 }
 0x16d   : > { %v3237_v13 = vand.u32 4294901760, %v3228_v7 }
 0x16f   : > { %2632 = vmatmul.mubr.f32.vlgmr.msra.gmra.mrb[0].mxu0 %v9606_v2  ;;  %v3320_v18 = vsub.f32 %v3228_v7, %v3237_v13 }
 0x170   : > { %2641 = vmatpush1.msra.mxu0 %v2249_v8  ;;  %2704 = vmatprep.mubr.f32.mxu0 %v9354_v0  ;;  %v3314_v8 = vsub.f32 %v3229_v60, %v3235_v4 }
 0x171   : > { %2742 = vmatprep.subr.mxu0 %v2741_v32  ;;  %v3321_v20 = vand.u32 4294901760, %v3320_v18 }
 0x172   : > { %v3315_v14 = vand.u32 4294901760, %v3314_v8 }
 0x173   : > { %v3322_v23 = vsub.f32 %v3320_v18, %v3321_v20 }
 0x174   : > { %v3316_v19 = vsub.f32 %v3314_v8, %v3315_v14 }
 0x175   : > { %v3323_v25 = vand.u32 4294901760, %v3322_v23 }
 0x176   : > { %v3317_v21 = vand.u32 4294901760, %v3316_v19 }
 0x177   : > { %2706 = vmatmul.mubr.f32.vlgmr.msra.gmra.mrb[0].mxu0 %v9606_v2  ;;  %v3233_v2 = vsel %vm302_vm0, %v9096_v6, 0  ;;  %v4199_v6 = vpop.permute.xlu1 %4198 }
 0x178   : > { %2744 = vmatpush1.msra.mxu0 %v2743_v41  ;;  %2807 = vmatprep.mubr.f32.mxu0 %v9354_v0  ;;  %v9668_v12 = vand.u32 4294901760, %v3233_v2 }
 0x179   : > { %2824 = vmatprep.subr.mxu0 %v2823_v49 }
 0x17a   : > { %v3303_v17 = vsub.f32 %v3233_v2, %v9668_v12 }
 0x17c   : > { %v3304_v1 = vand.u32 4294901760, %v3303_v17 }
 0x17e   : > { %v3305_v22 = vsub.f32 %v3303_v17, %v3304_v1 }
 0x17f   : > { %2813 = vmatmul.mubr.f32.vlgmr.msra.gmra.mrb[0].mxu0 %v2812_v52 }
 0x180   : > { %2830 = vmatpush1.msra.mxu0 %v2829_v53  ;;  %2893 = vmatprep.mubr.f32.mxu0 %v9354_v0  ;;  %v3306_v24 = vand.u32 4294901760, %v3305_v22 }
 0x181   : > { %2903 = vmatprep.subr.mxu0 %v2820_v39  ;;  %v9693_v39 = vrot.slane %v9097_v29, %v9454_v10 }
 0x187   : > { %2895 = vmatmul.mubr.f32.vlgmr.msra.gmra.mrb[0].mxu0 %v9636_v40 }
 0x188   : > { %2906 = vmatpush1.msra.mxu0 %v2826_v45  ;;  %2969 = vmatprep.mubr.f32.mxu0 %v9354_v0 }
 0x189   : > { %2979 = vmatprep.subr.mxu0 %v2741_v32 }
 0x18f   : > { %2972 = vmatmul.mubr.f32.vlgmr.msra.gmra.mrb[0].mxu0 %v2809_v44 }
 0x190   : > { %2981 = vmatpush1.msra.mxu0 %v2743_v41  ;;  %3044 = vmatprep.mubr.f32.mxu0 %v9354_v0 }
 0x191   : > { %3057 = vmatprep.subr.mxu0 %v2821_v43  ;;  %v9098_v43 = vld [vmem:[%s9936_s2 + $0x38] sm:$0xff] }
 0x192   : > { %v3727_v45 = vsel %vm302_vm0, %v9098_v43, 0 }
 0x197   : > { %3048 = vmatmul.mubr.f32.vlgmr.msra.gmra.mrb[0].mxu0 %v2810_v47  ;;  %v9703_v47 = vand.u32 4294901760, %v3727_v45 }
 0x198   : > { %3061 = vmatpush1.msra.mxu0 %v2827_v48  ;;  %3124 = vmatprep.mubr.f32.mxu0 %v9354_v0 }
 0x199   : > { %3133 = vmatprep.subr.mxu0 %v2741_v32  ;;  %v3703_v32 = vpop.permute.xlu0 %3702  ;;  %v3797_v50 = vsub.f32 %v3727_v45, %v9703_v47 }
 0x19a   : > { %v3708_v35 = vsel %vm3706_vm7, %v3705_v31, %v3703_v32 }
 0x19b   : > { %v3723_v38 = vmul.f32 %v9686_v34, %v3708_v35  ;;  %v3798_v53 = vand.u32 4294901760, %v3797_v50 }
 0x19d   : > { %v3799_v56 = vsub.f32 %v3797_v50, %v3798_v53  ;;  %v4197_v7 = vpop.permute.xlu0 %4196 }
 0x19f   : > { %3126 = vmatmul.mubr.f32.vlgmr.msra.gmra.mrb[0].mxu0 %v9636_v40  ;;  %v3800_v60 = vand.u32 4294901760, %v3799_v56 }
 0x1a0   : > { %3135 = vmatpush1.msra.mxu0 %v2743_v41  ;;  %3198 = vmatprep.mubr.f32.mxu0 %v9354_v0  ;;  %v3729_v41 = vand.u32 4294901760, %v3723_v38 }
 0x1a1   : > { %3236 = vmatprep.subr.mxu0 %v3235_v4 }
 0x1a2   : > { %v3808_v46 = vsub.f32 %v3723_v38, %v3729_v41  ;;  %v4694_v38 = vpop.permute.xlu0 %4693 }
 0x1a4   : > { %v3809_v49 = vand.u32 4294901760, %v3808_v46 }
 0x1a6   : > { %v3810_v52 = vsub.f32 %v3808_v46, %v3809_v49 }
 0x1a7   : > { %3200 = vmatmul.mubr.f32.vlgmr.msra.gmra.mrb[0].mxu0 %v9636_v40  ;;  %v3707_v40 = vsel %vm3706_vm7, %v3703_v32, %v3705_v31 }
 0x1a8   : > { %3238 = vmatpush1.msra.mxu0 %v3237_v13  ;;  %3301 = vmatprep.mubr.f32.mxu0 %v9354_v0  ;;  %v3722_v44 = vmul.f32 %v9693_v39, %v3707_v40  ;;  %v3811_v55 = vand.u32 4294901760, %v3810_v52 }
 0x1a9   : > { %3318 = vmatprep.subr.mxu0 %v3317_v21 }
 0x1aa   : > { %v3731_v48 = vand.u32 4294901760, %v3722_v44 }
 0x1ac   : > { %v3814_v51 = vsub.f32 %v3722_v44, %v3731_v48 }
 0x1ae   : > { %v3815_v54 = vand.u32 4294901760, %v3814_v51 }
 0x1af   : > { %3307 = vmatmul.mubr.f32.vlgmr.msra.gmra.mrb[0].mxu0 %v3306_v24 }
 0x1b0   : > { %3324 = vmatpush1.msra.mxu0 %v3323_v25  ;;  %3387 = vmatprep.mubr.f32.mxu0 %v9354_v0  ;;  %v3816_v58 = vsub.f32 %v3814_v51, %v3815_v54 }
 0x1b1   : > { %3397 = vmatprep.subr.mxu0 %v3314_v8  ;;  %v4202_v8 = vsel %vm4200_vm8, %v4199_v6, %v4197_v7 }
 0x1b2   : > { %v3817_v3 = vand.u32 4294901760, %v3816_v58 }
 0x1b7   : > { %3389 = vmatmul.mubr.f32.vlgmr.msra.gmra.mrb[0].mxu0 %v9668_v12 }
 0x1b8   : > { %3400 = vmatpush1.msra.mxu0 %v3320_v18  ;;  %3463 = vmatprep.mubr.f32.mxu0 %v9354_v0 }
 0x1b9   : > { %3473 = vmatprep.subr.mxu0 %v3235_v4 }
 0x1bf   : > { %3466 = vmatmul.mubr.f32.vlgmr.msra.gmra.mrb[0].mxu0 %v3303_v17 }
 0x1c0   : > { %3475 = vmatpush1.msra.mxu0 %v3237_v13  ;;  %3538 = vmatprep.mubr.f32.mxu0 %v9354_v0 }
 0x1c1   : > { %3551 = vmatprep.subr.mxu0 %v3315_v14  ;;  %v4201_v14 = vsel %vm4200_vm8, %v4197_v7, %v4199_v6 }
 0x1c7   : > { %3542 = vmatmul.mubr.f32.vlgmr.msra.gmra.mrb[0].mxu0 %v3304_v1 }
 0x1c8   : > { %3555 = vmatpush1.msra.mxu0 %v3321_v20  ;;  %3618 = vmatprep.mubr.f32.mxu0 %v9354_v0 }
 0x1c9   : > { %3627 = vmatprep.subr.mxu0 %v3235_v4  ;;  %v9099_v4 = vld [vmem:[%s9935_s1 + $0x10] sm:$0x3] }
 0x1ca   : > { %v9718_v2 = vrot.slane %v9099_v4, %v9456_v11  ;;  %v9100_v11 = vld [vmem:[%s9936_s2 + $0x40] sm:$0xff] }
 0x1cb   : > { %v4221_v19 = vsel %vm302_vm0, %v9100_v11, 0 }
 0x1cf   : > { %3620 = vmatmul.mubr.f32.vlgmr.msra.gmra.mrb[0].mxu0 %v9668_v12 }
 0x1d0   : > { %3629 = vmatpush1.msra.mxu0 %v3237_v13  ;;  %3692 = vmatprep.mubr.f32.mxu0 %v9354_v0  ;;  %v9725_v13 = vrot.slane %v9099_v4, %v9454_v10  ;;  %v4290_v10 = vand.u32 4294901760, %v4221_v19 }
 0x1d1   : > { %3730 = vmatprep.subr.mxu0 %v3729_v41 }
 0x1d2   : > { %v4216_v18 = vmul.f32 %v9725_v13, %v4201_v14  ;;  %v4291_v22 = vsub.f32 %v4221_v19, %v4290_v10 }
 0x1d4   : > { %v4225_v20 = vand.u32 4294901760, %v4216_v18  ;;  %v4292_v25 = vand.u32 4294901760, %v4291_v22 }
 0x1d6   : > { %v4308_v23 = vsub.f32 %v4216_v18, %v4225_v20  ;;  %v4293_v29 = vsub.f32 %v4291_v22, %v4292_v25 }
 0x1d7   : > { %3694 = vmatmul.mubr.f32.vlgmr.msra.gmra.mrb[0].mxu0 %v9668_v12  ;;  %v4217_v12 = vmul.f32 %v9718_v2, %v4202_v8 }
 0x1d8   : > { %3732 = vmatpush1.msra.mxu0 %v3731_v48  ;;  %3795 = vmatprep.mubr.f32.mxu0 %v9354_v0  ;;  %v4309_v26 = vand.u32 4294901760, %v4308_v23  ;;  %v4294_v32 = vand.u32 4294901760, %v4293_v29 }
 0x1d9   : > { %3812 = vmatprep.subr.mxu0 %v3811_v55  ;;  %v4223_v17 = vand.u32 4294901760, %v4217_v12 }
 0x1da   : > { %v4310_v31 = vsub.f32 %v4308_v23, %v4309_v26 }
 0x1db   : > { %v4302_v1 = vsub.f32 %v4217_v12, %v4223_v17 }
 0x1dc   : > { %v4311_v35 = vand.u32 4294901760, %v4310_v31 }
 0x1dd   : > { %v4303_v21 = vand.u32 4294901760, %v4302_v1 }
 0x1df   : > { %3801 = vmatmul.mubr.f32.vlgmr.msra.gmra.mrb[0].mxu0 %v3800_v60  ;;  %v4304_v24 = vsub.f32 %v4302_v1, %v4303_v21 }
 0x1e0   : > { %3818 = vmatpush1.msra.mxu0 %v3817_v3  ;;  %3881 = vmatprep.mubr.f32.mxu0 %v9354_v0 }
 0x1e1   : > { %3891 = vmatprep.subr.mxu0 %v3808_v46  ;;  %v4305_v28 = vand.u32 4294901760, %v4304_v24 }
 0x1e7   : > { %3883 = vmatmul.mubr.f32.vlgmr.msra.gmra.mrb[0].mxu0 %v9703_v47 }
 0x1e8   : > { %3894 = vmatpush1.msra.mxu0 %v3814_v51  ;;  %3957 = vmatprep.mubr.f32.mxu0 %v9354_v0 }
 0x1e9   : > { %3967 = vmatprep.subr.mxu0 %v3729_v41 }
 0x1ef   : > { %3960 = vmatmul.mubr.f32.vlgmr.msra.gmra.mrb[0].mxu0 %v3797_v50 }
 0x1f0   : > { %3969 = vmatpush1.msra.mxu0 %v3731_v48  ;;  %4032 = vmatprep.mubr.f32.mxu0 %v9354_v0 }
 0x1f1   : > { %4045 = vmatprep.subr.mxu0 %v3809_v49 }
 0x1f7   : > { %4036 = vmatmul.mubr.f32.vlgmr.msra.gmra.mrb[0].mxu0 %v3798_v53 }
 0x1f8   : > { %4049 = vmatpush1.msra.mxu0 %v3815_v54  ;;  %4112 = vmatprep.mubr.f32.mxu0 %v9354_v0 }
 0x1f9   : > { %4121 = vmatprep.subr.mxu0 %v3729_v41 }
 0x1ff   : > { %4114 = vmatmul.mubr.f32.vlgmr.msra.gmra.mrb[0].mxu0 %v9703_v47 }
 0x200   : > { %4123 = vmatpush1.msra.mxu0 %v3731_v48  ;;  %4186 = vmatprep.mubr.f32.mxu0 %v9354_v0  ;;  %v9101_v48 = vld [vmem:[%s9938_s4 + $0x8] sm:$0xff] }
 0x201   : > { %4224 = vmatprep.subr.mxu0 %v4223_v17  ;;  %v4720_v49 = vsel %vm302_vm0, %v9101_v48, 0 }
 0x202   : > { %v4789_v50 = vand.u32 4294901760, %v4720_v49 }
 0x204   : > { %v4790_v51 = vsub.f32 %v4720_v49, %v4789_v50 }
 0x206   : > { %v4791_v53 = vand.u32 4294901760, %v4790_v51 }
 0x207   : > { %4188 = vmatmul.mubr.f32.vlgmr.msra.gmra.mrb[0].mxu0 %v9703_v47  ;;  %v9009_v47 = vld [vmem:[%s9939_s5] sm:$0xff] }
 0x208   : > { %4226 = vmatpush1.msra.mxu0 %v4225_v20  ;;  %4289 = vmatprep.mubr.f32.mxu0 %v9354_v0  ;;  %v4792_v55 = vsub.f32 %v4790_v51, %v4791_v53 }
 0x209   : > { %4306 = vmatprep.subr.mxu0 %v4305_v28 }
 0x20a   : > { %v4793_v7 = vand.u32 4294901760, %v4792_v55 }
 0x20f   : > { %4295 = vmatmul.mubr.f32.vlgmr.msra.gmra.mrb[0].mxu0 %v4294_v32 }
 0x210   : > { %4312 = vmatpush1.msra.mxu0 %v4311_v35  ;;  %4375 = vmatprep.mubr.f32.mxu0 %v9354_v0 }
 0x211   : > { %4385 = vmatprep.subr.mxu0 %v4302_v1 }
 0x217   : > { %4377 = vmatmul.mubr.f32.vlgmr.msra.gmra.mrb[0].mxu0 %v4290_v10 }
 0x218   : > { %4388 = vmatpush1.msra.mxu0 %v4308_v23  ;;  %4451 = vmatprep.mubr.f32.mxu0 %v9354_v0 }
 0x219   : > { %4461 = vmatprep.subr.mxu0 %v4223_v17 }
 0x21f   : > { %4454 = vmatmul.mubr.f32.vlgmr.msra.gmra.mrb[0].mxu0 %v4291_v22 }
 0x220   : > { %4463 = vmatpush1.msra.mxu0 %v4225_v20  ;;  %4526 = vmatprep.mubr.f32.mxu0 %v9354_v0 }
 0x221   : > { %4539 = vmatprep.subr.mxu0 %v4303_v21  ;;  %v4708_v21 = vld [vmem:[%s9938_s4] sm:$0xff] }
 0x222   : > { %v5188_v24 = vsel %vm302_vm0, %v4708_v21, 0 }
 0x223   : > { %v5257_v28 = vand.u32 4294901760, %v5188_v24 }
 0x225   : > { %v5258_v31 = vsub.f32 %v5188_v24, %v5257_v28 }
 0x227   : > { %4530 = vmatmul.mubr.f32.vlgmr.msra.gmra.mrb[0].mxu0 %v4292_v25 }
 0x228   : > { %4543 = vmatpush1.msra.mxu0 %v4309_v26  ;;  %4606 = vmatprep.mubr.f32.mxu0 %v9354_v0 }
 0x229   : > { %4615 = vmatprep.subr.mxu0 %v4223_v17 }
 0x22f   : > { %4608 = vmatmul.mubr.f32.vlgmr.msra.gmra.mrb[0].mxu0 %v4290_v10 }
 0x230   : > { %4617 = vmatpush1.msra.mxu0 %v4225_v20  ;;  %4680 = vmatprep.mubr.f32.mxu0 %v9354_v0 }
 0x237   : > { %4682 = vmatmul.mubr.f32.vlgmr.msra.gmra.mrb[0].mxu0 %v4290_v10 }
 0x30a   : > { %v4683_v40 = vpop.f32.mrb[0].mxu0 }
 0x30b   : > { %v4696_v41 = vadd.f32 %v4694_v38, %v4683_v40  ;;  %v4685_v43 = vpop.f32.mrb[1].mxu0 }
 0x30c   : > { %v4697_v45 = vadd.f32 %v4694_v38, %v4685_v43  ;;  %v5259_v38 = vand.u32 4294901760, %v5258_v31 }
 0x30d   : > { %v9744_v44 = vmax.f32 %v4696_v41, 0.0 }
 0x30e   : > { %v9750_v46 = vmax.f32 %v4697_v45, 0.0  ;;  %v5260_v43 = vsub.f32 %v5258_v31, %v5259_v38 }
 0x30f   : > { %4700 = vrot.lane.b32.xlu0 %v9744_v44, %s9356_s28  ;;  %4709 = vrot.lane.b32.xlu1 %v9744_v44, %s9355_s27 }
 0x310   : > { %v5261_v45 = vand.u32 4294901760, %v5260_v43  ;;  %v6616_v43 = vmul.f32 %v9750_v46, %v9591_v59 }
 0x313   : > { %5655 = vrot.lane.b32.xlu0 %v9744_v44, %s9357_s29  ;;  %4711 = vrot.lane.b32.xlu1 %v9750_v46, %s9355_s27 }
 0x317   : > { %6135 = vrot.lane.b32.xlu0 %v9744_v44, %s9358_s30  ;;  %4702 = vrot.lane.b32.xlu1 %v9750_v46, %s9356_s28 }
 0x31b   : > { %7089 = vrot.lane.b32.xlu0 %v9744_v44, %s9359_s9  ;;  %5657 = vrot.lane.b32.xlu1 %v9750_v46, %s9357_s29  ;;  %s251_s29 = scalar_lea.vmem %s9940_s6, %s9111_s23 }
 0x31f   : > { %7569 = vrot.lane.b32.xlu0 %v9744_v44, %s9360_s16  ;;  %6137 = vrot.lane.b32.xlu1 %v9750_v46, %s9358_s30 }
 0x323   : > { %8049 = vrot.lane.b32.xlu0 %v9744_v44, %s9361_s24  ;;  %7091 = vrot.lane.b32.xlu1 %v9750_v46, %s9359_s9 }
 0x327   : > { %8529 = vrot.lane.b32.xlu0 %v9744_v44, %s9362_s11  ;;  %7571 = vrot.lane.b32.xlu1 %v9750_v46, %s9360_s16 }
 0x32b   : > { %9012 = vperm.xlu0 %9343, %v9009_v47   ;;  %8051 = vrot.lane.b32.xlu1 %v9750_v46, %s9361_s24 }
 0x32f   : > { %8531 = vrot.lane.b32.xlu1 %v9750_v46, %s9362_s11 }
 0x381   : > { %v4710_v52 = vpop.permute.xlu1 %4709 }
 0x385   : > { %v4712_v54 = vpop.permute.xlu1 %4711 }
 0x386   : > { %v4713_v56 = vsel %vm282_vm1, %v4710_v52, %v4712_v54  ;;  %v4714_v58 = vsel %vm282_vm1, %v4712_v54, %v4710_v52  ;;  %v9102_v52 = vld [vmem:[%s9938_s4 + $0x10] sm:$0xff] }
 0x387   : > { %v4715_v60 = vmul.f32 %v4714_v58, %v9463_v15  ;;  %v4716_v3 = vmul.f32 %v4713_v56, %v9466_v16  ;;  %v4701_v16 = vpop.permute.xlu0 %4700  ;;  %v5666_v55 = vsel %vm302_vm0, %v9102_v52, 0 }
 0x389   : > { %v4722_v4 = vand.u32 4294901760, %v4716_v3  ;;  %v4724_v6 = vand.u32 4294901760, %v4715_v60  ;;  %v4703_v15 = vpop.permute.xlu1 %4702 }
 0x38a   : > { %v4704_v10 = vsel %vm260_vm2, %v4701_v16, %v4703_v15  ;;  %v4705_v22 = vsel %vm260_vm2, %v4703_v15, %v4701_v16 }
 0x38b   : > { %v4801_v8 = vsub.f32 %v4716_v3, %v4722_v4  ;;  %v4807_v12 = vsub.f32 %v4715_v60, %v4724_v6  ;;  %4723 = vmatprep.subr.mxu1 %v4722_v4  ;;  %v4707_v20 = vmul.f32 %v4704_v10, %v9482_v37  ;;  %v4706_v25 = vmul.f32 %v4705_v22, %v9494_v42  ;;  %v5656_v49 = vpop.permute.xlu0 %5655  ;;  %v9103_v10 = vld [vmem:[%s9938_s4 + $0x18] sm:$0xff] }
 0x38c   : > { %4725 = vmatpush1.msra.mxu1 %v4724_v6  ;;  %v5735_v60 = vand.u32 4294901760, %v5666_v55  ;;  %v6146_v22 = vsel %vm302_vm0, %v9103_v10, 0 }
 0x38d   : > { %v4808_v14 = vand.u32 4294901760, %v4807_v12  ;;  %4794 = vmatmul.mubr.f32.vlgmr.msra.gmra.mrb[0].mxu1 %v4793_v7  ;;  %v4802_v17 = vand.u32 4294901760, %v4801_v8  ;;  %v5190_v23 = vand.u32 4294901760, %v4707_v20  ;;  %v5192_v37 = vand.u32 4294901760, %v4706_v25  ;;  %v5658_v48 = vpop.permute.xlu1 %5657 }
 0x38e   : > { %4874 = vmatprep.mubr.f32.mxu1 %v9354_v0 }
 0x38f   : > { %v4803_v11 = vsub.f32 %v4801_v8, %v4802_v17  ;;  %v4809_v18 = vsub.f32 %v4807_v12, %v4808_v14  ;;  %v5269_v26 = vsub.f32 %v4707_v20, %v5190_v23  ;;  %v5275_v32 = vsub.f32 %v4706_v25, %v5192_v37 }
 0x390   : > { %v6215_v25 = vand.u32 4294901760, %v6146_v22 }
 0x391   : > { %v4804_v19 = vand.u32 4294901760, %v4803_v11  ;;  %v4810_v1 = vand.u32 4294901760, %v4809_v18  ;;  %v5270_v29 = vand.u32 4294901760, %v5269_v26  ;;  %v5276_v40 = vand.u32 4294901760, %v5275_v32 }
 0x393   : > { %4805 = vmatprep.subr.mxu1 %v4804_v19  ;;  %v5271_v35 = vsub.f32 %v5269_v26, %v5270_v29  ;;  %v5277_v42 = vsub.f32 %v5275_v32, %v5276_v40  ;;  %v6138_v19 = vpop.permute.xlu1 %6137 }
 0x394   : > { %4811 = vmatpush1.msra.mxu1 %v4810_v1  ;;  %v6136_v1 = vpop.permute.xlu0 %6135 }
 0x395   : > { %4876 = vmatmul.mubr.f32.vlgmr.msra.gmra.mrb[0].mxu1 %v4789_v50  ;;  %4884 = vmatprep.subr.mxu1 %v4801_v8  ;;  %v5272_v41 = vand.u32 4294901760, %v5271_v35  ;;  %v5278_v47 = vand.u32 4294901760, %v5277_v42  ;;  %v6139_v15 = vsel %vm1737_vm4, %v6136_v1, %v6138_v19  ;;  %v6140_v20 = vsel %vm1737_vm4, %v6138_v19, %v6136_v1  ;;  %v9104_v42 = vld [vmem:[%s9938_s4 + $0x20] sm:$0xff] }
 0x396   : > { %4887 = vmatpush1.msra.mxu1 %v4807_v12  ;;  %4950 = vmatprep.mubr.f32.mxu1 %v9354_v0  ;;  %v6142_v16 = vmul.f32 %v6139_v15, %v9560_v33 }
 0x397   : > { %4960 = vmatprep.subr.mxu1 %v4722_v4 }
 0x398   : > { %v6148_v21 = vand.u32 4294901760, %v6142_v16 }
 0x39a   : > { %v6227_v24 = vsub.f32 %v6142_v16, %v6148_v21 }
 0x39d   : > { %4953 = vmatmul.mubr.f32.vlgmr.msra.gmra.mrb[0].mxu1 %v4790_v51 }
 0x39e   : > { %4962 = vmatpush1.msra.mxu1 %v4724_v6  ;;  %5025 = vmatprep.mubr.f32.mxu1 %v9354_v0 }
 0x39f   : > { %5038 = vmatprep.subr.mxu1 %v4802_v17 }
 0x3a5   : > { %5029 = vmatmul.mubr.f32.vlgmr.msra.gmra.mrb[0].mxu1 %v4791_v53  ;;  %v5660_v53 = vsel %vm1243_vm3, %v5658_v48, %v5656_v49 }
 0x3a6   : > { %5042 = vmatpush1.msra.mxu1 %v4808_v14  ;;  %5105 = vmatprep.mubr.f32.mxu1 %v9354_v0  ;;  %v5661_v56 = vmul.f32 %v5660_v53, %v9530_v5 }
 0x3a7   : > { %5114 = vmatprep.subr.mxu1 %v4722_v4  ;;  %v5736_v4 = vsub.f32 %v5666_v55, %v5735_v60 }
 0x3a9   : > { %v5737_v8 = vand.u32 4294901760, %v5736_v4 }
 0x3ab   : > { %v5738_v17 = vsub.f32 %v5736_v4, %v5737_v8 }
 0x3ad   : > { %5107 = vmatmul.mubr.f32.vlgmr.msra.gmra.mrb[0].mxu1 %v4789_v50  ;;  %v5739_v11 = vand.u32 4294901760, %v5738_v17 }
 0x3ae   : > { %5116 = vmatpush1.msra.mxu1 %v4724_v6  ;;  %5179 = vmatprep.mubr.f32.mxu1 %v9354_v0 }
 0x3af   : > { %5191 = vmatprep.subr.mxu1 %v5190_v23 }
 0x3b5   : > { %5181 = vmatmul.mubr.f32.vlgmr.msra.gmra.mrb[0].mxu1 %v4789_v50  ;;  %v5659_v50 = vsel %vm1243_vm3, %v5656_v49, %v5658_v48  ;;  %v6615_v48 = vmul.f32 %v9744_v44, %v9597_v61 }
 0x3b6   : > { %5193 = vmatpush1.msra.mxu1 %v5192_v37  ;;  %5256 = vmatprep.mubr.f32.mxu1 %v9354_v0  ;;  %v5662_v51 = vmul.f32 %v5659_v50, %v9523_v63  ;;  %v5670_v63 = vand.u32 4294901760, %v5661_v56 }
 0x3b7   : > { %5273 = vmatprep.subr.mxu1 %v5272_v41 }
 0x3b8   : > { %v5668_v54 = vand.u32 4294901760, %v5662_v51  ;;  %v5753_v6 = vsub.f32 %v5661_v56, %v5670_v63 }
 0x3ba   : > { %v5747_v58 = vsub.f32 %v5662_v51, %v5668_v54  ;;  %v5754_v12 = vand.u32 4294901760, %v5753_v6  ;;  %v6624_v51 = vand.u32 4294901760, %v6615_v48 }
 0x3bc   : > { %v5748_v3 = vand.u32 4294901760, %v5747_v58  ;;  %v5755_v5 = vsub.f32 %v5753_v6, %v5754_v12  ;;  %v6707_v52 = vsub.f32 %v6615_v48, %v6624_v51 }
 0x3bd   : > { %5262 = vmatmul.mubr.f32.vlgmr.msra.gmra.mrb[0].mxu1 %v5261_v45  ;;  %v6622_v45 = vand.u32 4294901760, %v6616_v43 }
 0x3be   : > { %5279 = vmatpush1.msra.mxu1 %v5278_v47  ;;  %5342 = vmatprep.mubr.f32.mxu1 %v9354_v0  ;;  %v5749_v7 = vsub.f32 %v5747_v58, %v5748_v3  ;;  %v5756_v18 = vand.u32 4294901760, %v5755_v5  ;;  %v6620_v47 = vsel %vm302_vm0, %v9104_v42, 0  ;;  %v6708_v55 = vand.u32 4294901760, %v6707_v52 }
 0x3bf   : > { %5352 = vmatprep.subr.mxu1 %v5269_v26  ;;  %v6228_v26 = vand.u32 4294901760, %v6227_v24  ;;  %v6701_v49 = vsub.f32 %v6616_v43, %v6622_v45  ;;  %v6689_v50 = vand.u32 4294901760, %v6620_v47 }
 0x3c0   : > { %v5750_v14 = vand.u32 4294901760, %v5749_v7  ;;  %v6709_v61 = vsub.f32 %v6707_v52, %v6708_v55  ;;  %v9105_v7 = vld [vmem:[%s9938_s4 + $0x28] sm:$0xff] }
 0x3c1   : > { %v6702_v59 = vand.u32 4294901760, %v6701_v49  ;;  %v6690_v46 = vsub.f32 %v6620_v47, %v6689_v50 }
 0x3c3   : > { %v6703_v53 = vsub.f32 %v6701_v49, %v6702_v59 }
 0x3c5   : > { %5344 = vmatmul.mubr.f32.vlgmr.msra.gmra.mrb[0].mxu1 %v5257_v28  ;;  %v6704_v56 = vand.u32 4294901760, %v6703_v53  ;;  %v9107_v53 = vld [vmem:[%s9938_s4 + $0x38] sm:$0xff] }
 0x3c6   : > { %5355 = vmatpush1.msra.mxu1 %v5275_v32  ;;  %5418 = vmatprep.mubr.f32.mxu1 %v9354_v0 }
 0x3c7   : > { %5428 = vmatprep.subr.mxu1 %v5190_v23 }
 0x3cd   : > { %5421 = vmatmul.mubr.f32.vlgmr.msra.gmra.mrb[0].mxu1 %v5258_v31 }
 0x3ce   : > { %5430 = vmatpush1.msra.mxu1 %v5192_v37  ;;  %5493 = vmatprep.mubr.f32.mxu1 %v9354_v0 }
 0x3cf   : > { %5506 = vmatprep.subr.mxu1 %v5270_v29  ;;  %v6229_v29 = vsub.f32 %v6227_v24, %v6228_v26 }
 0x3d1   : > { %v6230_v35 = vand.u32 4294901760, %v6229_v29 }
 0x3d5   : > { %5497 = vmatmul.mubr.f32.vlgmr.msra.gmra.mrb[0].mxu1 %v5259_v38 }
 0x3d6   : > { %5510 = vmatpush1.msra.mxu1 %v5276_v40  ;;  %5573 = vmatprep.mubr.f32.mxu1 %v9354_v0 }
 0x3d7   : > { %5582 = vmatprep.subr.mxu1 %v5190_v23  ;;  %v6141_v23 = vmul.f32 %v6140_v20, %v9567_v36 }
 0x3d9   : > { %v6150_v33 = vand.u32 4294901760, %v6141_v23 }
 0x3dd   : > { %5575 = vmatmul.mubr.f32.vlgmr.msra.gmra.mrb[0].mxu1 %v5257_v28 }
 0x3de   : > { %5584 = vmatpush1.msra.mxu1 %v5192_v37  ;;  %5647 = vmatprep.mubr.f32.mxu1 %v9354_v0  ;;  %v6233_v37 = vsub.f32 %v6141_v23, %v6150_v33 }
 0x3df   : > { %5669 = vmatprep.subr.mxu1 %v5668_v54 }
 0x3e0   : > { %v6234_v32 = vand.u32 4294901760, %v6233_v37 }
 0x3e2   : > { %v6235_v36 = vsub.f32 %v6233_v37, %v6234_v32 }
 0x3e4   : > { %v6236_v41 = vand.u32 4294901760, %v6235_v36 }
 0x3e5   : > { %5649 = vmatmul.mubr.f32.vlgmr.msra.gmra.mrb[0].mxu1 %v5257_v28  ;;  %v6216_v28 = vsub.f32 %v6146_v22, %v6215_v25 }
 0x3e6   : > { %5671 = vmatpush1.msra.mxu1 %v5670_v63  ;;  %5734 = vmatprep.mubr.f32.mxu1 %v9354_v0 }
 0x3e7   : > { %5751 = vmatprep.subr.mxu1 %v5750_v14  ;;  %v6217_v31 = vand.u32 4294901760, %v6216_v28  ;;  %v7100_v14 = vsel %vm302_vm0, %v9105_v7, 0 }
 0x3e9   : > { %v6218_v38 = vsub.f32 %v6216_v28, %v6217_v31 }
 0x3eb   : > { %v6219_v40 = vand.u32 4294901760, %v6218_v38 }
 0x3ed   : > { %5740 = vmatmul.mubr.f32.vlgmr.msra.gmra.mrb[0].mxu1 %v5739_v11  ;;  %v7169_v11 = vand.u32 4294901760, %v7100_v14 }
 0x3ee   : > { %5757 = vmatpush1.msra.mxu1 %v5756_v18  ;;  %5820 = vmatprep.mubr.f32.mxu1 %v9354_v0 }
 0x3ef   : > { %5830 = vmatprep.subr.mxu1 %v5747_v58  ;;  %v7170_v19 = vsub.f32 %v7100_v14, %v7169_v11 }
 0x3f1   : > { %v7171_v16 = vand.u32 4294901760, %v7170_v19 }
 0x3f5   : > { %5822 = vmatmul.mubr.f32.vlgmr.msra.gmra.mrb[0].mxu1 %v5735_v60 }
 0x3f6   : > { %5833 = vmatpush1.msra.mxu1 %v5753_v6  ;;  %5896 = vmatprep.mubr.f32.mxu1 %v9354_v0 }
 0x3f7   : > { %5906 = vmatprep.subr.mxu1 %v5668_v54 }
 0x3fd   : > { %5899 = vmatmul.mubr.f32.vlgmr.msra.gmra.mrb[0].mxu1 %v5736_v4 }
 0x3fe   : > { %5908 = vmatpush1.msra.mxu1 %v5670_v63  ;;  %5971 = vmatprep.mubr.f32.mxu1 %v9354_v0 }
 0x3ff   : > { %5984 = vmatprep.subr.mxu1 %v5748_v3  ;;  %v7090_v3 = vpop.permute.xlu0 %7089 }
 0x405   : > { %5975 = vmatmul.mubr.f32.vlgmr.msra.gmra.mrb[0].mxu1 %v5737_v8 }
 0x406   : > { %5988 = vmatpush1.msra.mxu1 %v5754_v12  ;;  %6051 = vmatprep.mubr.f32.mxu1 %v9354_v0 }
 0x407   : > { %6060 = vmatprep.subr.mxu1 %v5668_v54  ;;  %v6691_v54 = vand.u32 4294901760, %v6690_v46 }
 0x409   : > { %v6692_v58 = vsub.f32 %v6690_v46, %v6691_v54 }
 0x40b   : > { %v6693_v44 = vand.u32 4294901760, %v6692_v58 }
 0x40d   : > { %6053 = vmatmul.mubr.f32.vlgmr.msra.gmra.mrb[0].mxu1 %v5735_v60 }
 0x40e   : > { %6062 = vmatpush1.msra.mxu1 %v5670_v63  ;;  %6125 = vmatprep.mubr.f32.mxu1 %v9354_v0  ;;  %v7092_v63 = vpop.permute.xlu1 %7091 }
 0x40f   : > { %6149 = vmatprep.subr.mxu1 %v6148_v21  ;;  %v7094_v4 = vsel %vm2718_vm5, %v7092_v63, %v7090_v3  ;;  %v7093_v8 = vsel %vm2718_vm5, %v7090_v3, %v7092_v63 }
 0x410   : > { %v7096_v6 = vmul.f32 %v7094_v4, %v9619_v27  ;;  %v7095_v17 = vmul.f32 %v7093_v8, %v9626_v30 }
 0x412   : > { %v7102_v12 = vand.u32 4294901760, %v7096_v6  ;;  %v7104_v27 = vand.u32 4294901760, %v7095_v17 }
 0x414   : > { %v7181_v5 = vsub.f32 %v7096_v6, %v7102_v12  ;;  %v7187_v1 = vsub.f32 %v7095_v17, %v7104_v27 }
 0x415   : > { %6127 = vmatmul.mubr.f32.vlgmr.msra.gmra.mrb[0].mxu1 %v5735_v60  ;;  %v6710_v60 = vand.u32 4294901760, %v6709_v61 }
 0x416   : > { %6151 = vmatpush1.msra.mxu1 %v6150_v33  ;;  %6214 = vmatprep.mubr.f32.mxu1 %v9354_v0  ;;  %v7182_v18 = vand.u32 4294901760, %v7181_v5  ;;  %v7188_v10 = vand.u32 4294901760, %v7187_v1 }
 0x417   : > { %6231 = vmatprep.subr.mxu1 %v6230_v35 }
 0x418   : > { %v7183_v15 = vsub.f32 %v7181_v5, %v7182_v18  ;;  %v7189_v30 = vsub.f32 %v7187_v1, %v7188_v10 }
 0x41a   : > { %v7184_v20 = vand.u32 4294901760, %v7183_v15  ;;  %v7190_v23 = vand.u32 4294901760, %v7189_v30 }
 0x41d   : > { %6220 = vmatmul.mubr.f32.vlgmr.msra.gmra.mrb[0].mxu1 %v6219_v40 }
 0x41e   : > { %6237 = vmatpush1.msra.mxu1 %v6236_v41  ;;  %6300 = vmatprep.mubr.f32.mxu1 %v9354_v0 }
 0x41f   : > { %6310 = vmatprep.subr.mxu1 %v6227_v24  ;;  %v7572_v24 = vpop.permute.xlu1 %7571 }
 0x425   : > { %6302 = vmatmul.mubr.f32.vlgmr.msra.gmra.mrb[0].mxu1 %v6215_v25 }
 0x426   : > { %6313 = vmatpush1.msra.mxu1 %v6233_v37  ;;  %6376 = vmatprep.mubr.f32.mxu1 %v9354_v0 }
 0x427   : > { %6386 = vmatprep.subr.mxu1 %v6148_v21 }
 0x42d   : > { %6379 = vmatmul.mubr.f32.vlgmr.msra.gmra.mrb[0].mxu1 %v6216_v28  ;;  %v9106_v28 = vld [vmem:[%s9938_s4 + $0x30] sm:$0xff] }
 0x42e   : > { %6388 = vmatpush1.msra.mxu1 %v6150_v33  ;;  %6451 = vmatprep.mubr.f32.mxu1 %v9354_v0 }
 0x42f   : > { %6464 = vmatprep.subr.mxu1 %v6228_v26 }
 0x435   : > { %6455 = vmatmul.mubr.f32.vlgmr.msra.gmra.mrb[0].mxu1 %v6217_v31  ;;  %v7580_v31 = vsel %vm302_vm0, %v9106_v28, 0 }
 0x436   : > { %6468 = vmatpush1.msra.mxu1 %v6234_v32  ;;  %6531 = vmatprep.mubr.f32.mxu1 %v9354_v0  ;;  %v7649_v38 = vand.u32 4294901760, %v7580_v31 }
 0x437   : > { %6540 = vmatprep.subr.mxu1 %v6148_v21  ;;  %v7172_v21 = vsub.f32 %v7170_v19, %v7171_v16 }
 0x438   : > { %v7650_v40 = vsub.f32 %v7580_v31, %v7649_v38 }
 0x439   : > { %v7173_v22 = vand.u32 4294901760, %v7172_v21 }
 0x43a   : > { %v7651_v42 = vand.u32 4294901760, %v7650_v40 }
 0x43c   : > { %v7652_v48 = vsub.f32 %v7650_v40, %v7651_v42 }
 0x43d   : > { %6533 = vmatmul.mubr.f32.vlgmr.msra.gmra.mrb[0].mxu1 %v6215_v25 }
 0x43e   : > { %6542 = vmatpush1.msra.mxu1 %v6150_v33  ;;  %6605 = vmatprep.mubr.f32.mxu1 %v9354_v0 }
 0x43f   : > { %6623 = vmatprep.subr.mxu1 %v6622_v45 }
 0x445   : > { %6607 = vmatmul.mubr.f32.vlgmr.msra.gmra.mrb[0].mxu1 %v6215_v25  ;;  %v7570_v25 = vpop.permute.xlu0 %7569 }
 0x446   : > { %6625 = vmatpush1.msra.mxu1 %v6624_v51  ;;  %6688 = vmatprep.mubr.f32.mxu1 %v9354_v0  ;;  %v7574_v33 = vsel %vm3212_vm6, %v7572_v24, %v7570_v25  ;;  %v7573_v37 = vsel %vm3212_vm6, %v7570_v25, %v7572_v24 }
 0x447   : > { %6705 = vmatprep.subr.mxu1 %v6704_v56  ;;  %v7576_v26 = vmul.f32 %v7574_v33, %v9651_v57  ;;  %v7575_v32 = vmul.f32 %v7573_v37, %v9658_v62  ;;  %v8060_v56 = vsel %vm302_vm0, %v9107_v53, 0 }
 0x449   : > { %v7582_v29 = vand.u32 4294901760, %v7576_v26  ;;  %v7584_v57 = vand.u32 4294901760, %v7575_v32 }
 0x44b   : > { %v7661_v35 = vsub.f32 %v7576_v26, %v7582_v29  ;;  %v7667_v41 = vsub.f32 %v7575_v32, %v7584_v57 }
 0x44d   : > { %6694 = vmatmul.mubr.f32.vlgmr.msra.gmra.mrb[0].mxu1 %v6693_v44  ;;  %v7662_v36 = vand.u32 4294901760, %v7661_v35  ;;  %v8129_v44 = vand.u32 4294901760, %v8060_v56 }
 0x44e   : > { %6711 = vmatpush1.msra.mxu1 %v6710_v60  ;;  %6774 = vmatprep.mubr.f32.mxu1 %v9354_v0 }
 0x44f   : > { %6784 = vmatprep.subr.mxu1 %v6701_v49  ;;  %v7663_v43 = vsub.f32 %v7661_v35, %v7662_v36  ;;  %v7653_v49 = vand.u32 4294901760, %v7652_v48  ;;  %v8130_v63 = vsub.f32 %v8060_v56, %v8129_v44 }
 0x451   : > { %v7664_v47 = vand.u32 4294901760, %v7663_v43  ;;  %v8131_v6 = vand.u32 4294901760, %v8130_v63 }
 0x455   : > { %6776 = vmatmul.mubr.f32.vlgmr.msra.gmra.mrb[0].mxu1 %v6689_v50 }
 0x456   : > { %6787 = vmatpush1.msra.mxu1 %v6707_v52  ;;  %6850 = vmatprep.mubr.f32.mxu1 %v9354_v0 }
 0x457   : > { %6860 = vmatprep.subr.mxu1 %v6622_v45 }
 0x45d   : > { %6853 = vmatmul.mubr.f32.vlgmr.msra.gmra.mrb[0].mxu1 %v6690_v46 }
 0x45e   : > { %6862 = vmatpush1.msra.mxu1 %v6624_v51  ;;  %6925 = vmatprep.mubr.f32.mxu1 %v9354_v0 }
 0x45f   : > { %6938 = vmatprep.subr.mxu1 %v6702_v59  ;;  %v8050_v59 = vpop.permute.xlu0 %8049 }
 0x465   : > { %6929 = vmatmul.mubr.f32.vlgmr.msra.gmra.mrb[0].mxu1 %v6691_v54 }
 0x466   : > { %6942 = vmatpush1.msra.mxu1 %v6708_v55  ;;  %7005 = vmatprep.mubr.f32.mxu1 %v9354_v0 }
 0x467   : > { %7014 = vmatprep.subr.mxu1 %v6622_v45  ;;  %v7668_v45 = vand.u32 4294901760, %v7667_v41 }
 0x469   : > { %v7669_v62 = vsub.f32 %v7667_v41, %v7668_v45 }
 0x46d   : > { %7007 = vmatmul.mubr.f32.vlgmr.msra.gmra.mrb[0].mxu1 %v6689_v50 }
 0x46e   : > { %7016 = vmatpush1.msra.mxu1 %v6624_v51  ;;  %7079 = vmatprep.mubr.f32.mxu1 %v9354_v0  ;;  %v8052_v51 = vpop.permute.xlu1 %8051 }
 0x46f   : > { %7103 = vmatprep.subr.mxu1 %v7102_v12  ;;  %v8054_v46 = vsel %vm3706_vm7, %v8052_v51, %v8050_v59  ;;  %v8053_v54 = vsel %vm3706_vm7, %v8050_v59, %v8052_v51 }
 0x470   : > { %v8056_v52 = vmul.f32 %v8054_v46, %v9686_v34  ;;  %v8055_v58 = vmul.f32 %v8053_v54, %v9693_v39 }
 0x472   : > { %v8062_v55 = vand.u32 4294901760, %v8056_v52  ;;  %v8064_v34 = vand.u32 4294901760, %v8055_v58 }
 0x474   : > { %v8141_v61 = vsub.f32 %v8056_v52, %v8062_v55  ;;  %v8147_v3 = vsub.f32 %v8055_v58, %v8064_v34 }
 0x475   : > { %7081 = vmatmul.mubr.f32.vlgmr.msra.gmra.mrb[0].mxu1 %v6689_v50  ;;  %v7670_v50 = vand.u32 4294901760, %v7669_v62 }
 0x476   : > { %7105 = vmatpush1.msra.mxu1 %v7104_v27  ;;  %7168 = vmatprep.mubr.f32.mxu1 %v9354_v0  ;;  %v8142_v60 = vand.u32 4294901760, %v8141_v61  ;;  %v8148_v7 = vand.u32 4294901760, %v8147_v3 }
 0x477   : > { %7185 = vmatprep.subr.mxu1 %v7184_v20 }
 0x478   : > { %v8143_v4 = vsub.f32 %v8141_v61, %v8142_v60  ;;  %v8149_v39 = vsub.f32 %v8147_v3, %v8148_v7 }
 0x47a   : > { %v8144_v8 = vand.u32 4294901760, %v8143_v4  ;;  %v8150_v17 = vand.u32 4294901760, %v8149_v39 }
 0x47d   : > { %7174 = vmatmul.mubr.f32.vlgmr.msra.gmra.mrb[0].mxu1 %v7173_v22 }
 0x47e   : > { %7191 = vmatpush1.msra.mxu1 %v7190_v23  ;;  %7254 = vmatprep.mubr.f32.mxu1 %v9354_v0 }
 0x47f   : > { %7264 = vmatprep.subr.mxu1 %v7181_v5  ;;  %v8532_v5 = vpop.permute.xlu1 %8531 }
 0x485   : > { %7256 = vmatmul.mubr.f32.vlgmr.msra.gmra.mrb[0].mxu1 %v7169_v11 }
 0x486   : > { %7267 = vmatpush1.msra.mxu1 %v7187_v1  ;;  %7330 = vmatprep.mubr.f32.mxu1 %v9354_v0 }
 0x487   : > { %7340 = vmatprep.subr.mxu1 %v7102_v12 }
 0x48d   : > { %7333 = vmatmul.mubr.f32.vlgmr.msra.gmra.mrb[0].mxu1 %v7170_v19  ;;  %v9108_v19 = vld [vmem:[%s9938_s4 + $0x40] sm:$0xff] }
 0x48e   : > { %7342 = vmatpush1.msra.mxu1 %v7104_v27  ;;  %7405 = vmatprep.mubr.f32.mxu1 %v9354_v0 }
 0x48f   : > { %7418 = vmatprep.subr.mxu1 %v7182_v18 }
 0x495   : > { %7409 = vmatmul.mubr.f32.vlgmr.msra.gmra.mrb[0].mxu1 %v7171_v16  ;;  %v8540_v16 = vsel %vm302_vm0, %v9108_v19, 0 }
 0x496   : > { %7422 = vmatpush1.msra.mxu1 %v7188_v10  ;;  %7485 = vmatprep.mubr.f32.mxu1 %v9354_v0  ;;  %v8609_v21 = vand.u32 4294901760, %v8540_v16 }
 0x497   : > { %7494 = vmatprep.subr.mxu1 %v7102_v12  ;;  %v8132_v12 = vsub.f32 %v8130_v63, %v8131_v6 }
 0x498   : > { %v8610_v22 = vsub.f32 %v8540_v16, %v8609_v21 }
 0x499   : > { %v8133_v14 = vand.u32 4294901760, %v8132_v12 }
 0x49a   : > { %v8611_v24 = vand.u32 4294901760, %v8610_v22 }
 0x49c   : > { %v8612_v26 = vsub.f32 %v8610_v22, %v8611_v24 }
 0x49d   : > { %7487 = vmatmul.mubr.f32.vlgmr.msra.gmra.mrb[0].mxu1 %v7169_v11 }
 0x49e   : > { %7496 = vmatpush1.msra.mxu1 %v7104_v27  ;;  %7559 = vmatprep.mubr.f32.mxu1 %v9354_v0  ;;  %v8613_v28 = vand.u32 4294901760, %v8612_v26 }
 0x49f   : > { %7583 = vmatprep.subr.mxu1 %v7582_v29 }
 0x4a5   : > { %7561 = vmatmul.mubr.f32.vlgmr.msra.gmra.mrb[0].mxu1 %v7169_v11  ;;  %v8530_v11 = vpop.permute.xlu0 %8529 }
 0x4a6   : > { %7585 = vmatpush1.msra.mxu1 %v7584_v57  ;;  %7648 = vmatprep.mubr.f32.mxu1 %v9354_v0  ;;  %v8534_v27 = vsel %vm4200_vm8, %v8532_v5, %v8530_v11  ;;  %v8533_v1 = vsel %vm4200_vm8, %v8530_v11, %v8532_v5 }
 0x4a7   : > { %7665 = vmatprep.subr.mxu1 %v7664_v47  ;;  %v8536_v18 = vmul.f32 %v8534_v27, %v9718_v2  ;;  %v8535_v10 = vmul.f32 %v8533_v1, %v9725_v13 }
 0x4a9   : > { %v8542_v15 = vand.u32 4294901760, %v8536_v18  ;;  %v8544_v2 = vand.u32 4294901760, %v8535_v10 }
 0x4ab   : > { %v8621_v20 = vsub.f32 %v8536_v18, %v8542_v15  ;;  %v8627_v9 = vsub.f32 %v8535_v10, %v8544_v2 }
 0x4ad   : > { %7654 = vmatmul.mubr.f32.vlgmr.msra.gmra.mrb[0].mxu1 %v7653_v49  ;;  %v8622_v30 = vand.u32 4294901760, %v8621_v20  ;;  %v8628_v25 = vand.u32 4294901760, %v8627_v9 }
 0x4ae   : > { %7671 = vmatpush1.msra.mxu1 %v7670_v50  ;;  %7734 = vmatprep.mubr.f32.mxu1 %v9354_v0 }
 0x4af   : > { %7744 = vmatprep.subr.mxu1 %v7661_v35  ;;  %v8623_v23 = vsub.f32 %v8621_v20, %v8622_v30  ;;  %v8629_v13 = vsub.f32 %v8627_v9, %v8628_v25 }
 0x4b1   : > { %v8624_v33 = vand.u32 4294901760, %v8623_v23  ;;  %v8630_v37 = vand.u32 4294901760, %v8629_v13 }
 0x4b5   : > { %7736 = vmatmul.mubr.f32.vlgmr.msra.gmra.mrb[0].mxu1 %v7649_v38 }
 0x4b6   : > { %7747 = vmatpush1.msra.mxu1 %v7667_v41  ;;  %7810 = vmatprep.mubr.f32.mxu1 %v9354_v0 }
 0x4b7   : > { %7820 = vmatprep.subr.mxu1 %v7582_v29 }
 0x4bd   : > { %7813 = vmatmul.mubr.f32.vlgmr.msra.gmra.mrb[0].mxu1 %v7650_v40  ;;  %v9345_v40 = vld [vmem:[%s9417_s26 + $0x8] sm:$0xff] }
 0x4be   : > { %7822 = vmatpush1.msra.mxu1 %v7584_v57  ;;  %7885 = vmatprep.mubr.f32.mxu1 %v9354_v0 }
 0x4bf   : > { %7898 = vmatprep.subr.mxu1 %v7662_v36 }
 0x4c5   : > { %7889 = vmatmul.mubr.f32.vlgmr.msra.gmra.mrb[0].mxu1 %v7651_v42 }
 0x4c6   : > { %7902 = vmatpush1.msra.mxu1 %v7668_v45  ;;  %7965 = vmatprep.mubr.f32.mxu1 %v9354_v0 }
 0x4c7   : > { %7974 = vmatprep.subr.mxu1 %v7582_v29  ;;  %v9013_v29 = vpop.permute.xlu0 %9012 }
 0x4cd   : > { %7967 = vmatmul.mubr.f32.vlgmr.msra.gmra.mrb[0].mxu1 %v7649_v38 }
 0x4ce   : > { %7976 = vmatpush1.msra.mxu1 %v7584_v57  ;;  %8039 = vmatprep.mubr.f32.mxu1 %v9354_v0  ;;  %v9344_v57 = vld [vmem:[%s9417_s26] sm:$0xff] }
 0x4cf   : > { %8063 = vmatprep.subr.mxu1 %v8062_v55 }
 0x4d5   : > { %8041 = vmatmul.mubr.f32.vlgmr.msra.gmra.mrb[0].mxu1 %v7649_v38 }
 0x4d6   : > { %8065 = vmatpush1.msra.mxu1 %v8064_v34  ;;  %8128 = vmatprep.mubr.f32.mxu1 %v9354_v0 }
 0x4d7   : > { %8145 = vmatprep.subr.mxu1 %v8144_v8 }
 0x4dd   : > { %8134 = vmatmul.mubr.f32.vlgmr.msra.gmra.mrb[0].mxu1 %v8133_v14 }
 0x4de   : > { %8151 = vmatpush1.msra.mxu1 %v8150_v17  ;;  %8214 = vmatprep.mubr.f32.mxu1 %v9354_v0 }
 0x4df   : > { %8224 = vmatprep.subr.mxu1 %v8141_v61 }
 0x4e5   : > { %8216 = vmatmul.mubr.f32.vlgmr.msra.gmra.mrb[0].mxu1 %v8129_v44 }
 0x4e6   : > { %8227 = vmatpush1.msra.mxu1 %v8147_v3  ;;  %8290 = vmatprep.mubr.f32.mxu1 %v9354_v0 }
 0x4e7   : > { %8300 = vmatprep.subr.mxu1 %v8062_v55 }
 0x4ed   : > { %8293 = vmatmul.mubr.f32.vlgmr.msra.gmra.mrb[0].mxu1 %v8130_v63 }
 0x4ee   : > { %8302 = vmatpush1.msra.mxu1 %v8064_v34  ;;  %8365 = vmatprep.mubr.f32.mxu1 %v9354_v0 }
 0x4ef   : > { %8378 = vmatprep.subr.mxu1 %v8142_v60 }
 0x4f5   : > { %8369 = vmatmul.mubr.f32.vlgmr.msra.gmra.mrb[0].mxu1 %v8131_v6 }
 0x4f6   : > { %8382 = vmatpush1.msra.mxu1 %v8148_v7  ;;  %8445 = vmatprep.mubr.f32.mxu1 %v9354_v0 }
 0x4f7   : > { %8454 = vmatprep.subr.mxu1 %v8062_v55 }
 0x4fd   : > { %8447 = vmatmul.mubr.f32.vlgmr.msra.gmra.mrb[0].mxu1 %v8129_v44 }
 0x4fe   : > { %8456 = vmatpush1.msra.mxu1 %v8064_v34  ;;  %8519 = vmatprep.mubr.f32.mxu1 %v9354_v0 }
 0x4ff   : > { %8543 = vmatprep.subr.mxu1 %v8542_v15 }
 0x505   : > { %8521 = vmatmul.mubr.f32.vlgmr.msra.gmra.mrb[0].mxu1 %v8129_v44 }
 0x506   : > { %8545 = vmatpush1.msra.mxu1 %v8544_v2  ;;  %8608 = vmatprep.mubr.f32.mxu1 %v9354_v0 }
 0x507   : > { %8625 = vmatprep.subr.mxu1 %v8624_v33 }
 0x50d   : > { %8614 = vmatmul.mubr.f32.vlgmr.msra.gmra.mrb[0].mxu1 %v8613_v28 }
 0x50e   : > { %8631 = vmatpush1.msra.mxu1 %v8630_v37  ;;  %8694 = vmatprep.mubr.f32.mxu1 %v9354_v0 }
 0x50f   : > { %8704 = vmatprep.subr.mxu1 %v8621_v20 }
 0x515   : > { %8696 = vmatmul.mubr.f32.vlgmr.msra.gmra.mrb[0].mxu1 %v8609_v21 }
 0x516   : > { %8707 = vmatpush1.msra.mxu1 %v8627_v9  ;;  %8770 = vmatprep.mubr.f32.mxu1 %v9354_v0 }
 0x517   : > { %8780 = vmatprep.subr.mxu1 %v8542_v15 }
 0x51d   : > { %8773 = vmatmul.mubr.f32.vlgmr.msra.gmra.mrb[0].mxu1 %v8610_v22 }
 0x51e   : > { %8782 = vmatpush1.msra.mxu1 %v8544_v2  ;;  %8845 = vmatprep.mubr.f32.mxu1 %v9354_v0 }
 0x51f   : > { %8858 = vmatprep.subr.mxu1 %v8622_v30 }
 0x525   : > { %8849 = vmatmul.mubr.f32.vlgmr.msra.gmra.mrb[0].mxu1 %v8611_v24 }
 0x526   : > { %8862 = vmatpush1.msra.mxu1 %v8628_v25  ;;  %8925 = vmatprep.mubr.f32.mxu1 %v9354_v0 }
 0x527   : > { %8934 = vmatprep.subr.mxu1 %v8542_v15 }
 0x52d   : > { %8927 = vmatmul.mubr.f32.vlgmr.msra.gmra.mrb[0].mxu1 %v8609_v21 }
 0x52e   : > { %8936 = vmatpush1.msra.mxu1 %v8544_v2  ;;  %8999 = vmatprep.mubr.f32.mxu1 %v9354_v0 }
 0x535   : > { %9001 = vmatmul.mubr.f32.vlgmr.msra.gmra.mrb[0].mxu1 %v8609_v21 }
 0x608   : > { %v9002_v31 = vpop.f32.mrb[0].mxu1 }
 0x609   : > { %v9015_v32 = vadd.f32 %v9013_v29, %v9002_v31  ;;  %v9004_v35 = vpop.f32.mrb[1].mxu1 }
 0x60a   : > { %v9016_v38 = vadd.f32 %v9013_v29, %v9004_v35 }
 0x60b   : > { %v9017_v36 = vadd.f32 %v9344_v57, %v9015_v32 }
 0x60c   : > { %v9018_v41 = vadd.f32 %v9345_v40, %v9016_v38 }
 0x60d   : > { %9019 = vst [vmem:[%s251_s29] sm:$0xff] %v9017_v36 }
 0x60e   : > { %9020 = vst [vmem:[%s251_s29 + $0x8] sm:$0xff] %v9018_v41 }
 0x60f PF: > { %s16_s21 = sadd.s32 1, %s9352_s21  }
 0x610   : > { %p13_p4 = scmp.ge.s32.totalorder %s16_s21, 4  }
 0x612   :  { %15 = sbr.rel (!%p13_p4) target bundleno = 1 (0x1), region = 98 }

</bundles_post_ra>
